<compile_context>
chip_gen: v5e
topology: v5e:2x2
jax: 0.10.0
libtpu: 0.0.40
codegen_flags: <defaults>
</compile_context>

<pallas_src>
import functools

import jax
import jax.numpy as jnp
from jax.experimental import pallas as pl
from jax.experimental.pallas import tpu as pltpu  # noqa: F401  (kept for TPU-specific tuning hooks)


# ----------------------------------------------------------------------------
# Config (scaled-down BERT; bert-base-uncased weights cannot be loaded here)
# ----------------------------------------------------------------------------

class Config:
    vocab_size = 100
    type_vocab_size = 2
    max_position = 16
    hidden = 32
    num_layers = 2
    num_heads = 2
    head_dim = 16          # hidden // num_heads
    intermediate = 64
    layer_norm_eps = 1e-12


# ----------------------------------------------------------------------------
# Fully fused Pallas kernel: embeddings-LN + encoder + classification heads
# (single invocation, whole batch, all weights VMEM-resident)
# ----------------------------------------------------------------------------

def _encoder_heads_kernel(
        x_ref, mask_ref,
        wh_ref, wffn_ref, vec_ref,
        whead_ref, bhead_ref,
        logits_ref,
        *, num_layers, num_heads, head_dim, hidden, intermediate, eps):
    """x_ref: (B*S, H) summed embeddings (pre-LN).
       mask_ref: (B*S, B*S) additive mask (block-diagonal over batch + padding).
       Produces classifier logits for every row; the wrapper picks the CLS rows.
    """
    H, I = hidden, intermediate

    vecs = vec_ref[...]                                  # (2 + 8L, 3H)

    def vec(r, w):                                       # (1, w) bias / LN row
        return vecs[r:r + 1, :w]

    def layernorm(x, g, b):
        mean = jnp.mean(x, axis=-1, keepdims=True)
        var = jnp.mean(jnp.square(x - mean), axis=-1, keepdims=True)
        return (x - mean) * jax.lax.rsqrt(var + eps) * g + b

    def gelu(x):  # erf-based GELU (matches BERT / HF "gelu")
        return x * 0.5 * (1.0 + jax.lax.erf(x * 0.7071067811865476))

    x = x_ref[...].astype(jnp.float32)                   # (BS, H)
    x = layernorm(x, vec(0, H), vec(1, H))               # embedding LayerNorm
    mask_bd = mask_ref[...].astype(jnp.float32)          # (BS, BS)

    # contract last dims of q and k -> q @ k^T without an explicit transpose
    qk_dims = (((1,), (1,)), ((), ()))

    for l in range(num_layers):                          # static unroll
        base = 2 + l * 8
        wh_l = wh_ref[l]                                 # (H, 3H + H + I)
        wqkv = wh_l[:, 0:3 * H]                          # (H, 3H) (scale pre-folded)
        wo = wh_l[:, 3 * H:4 * H]                        # (H, H)
        wi = wh_l[:, 4 * H:4 * H + I]                    # (H, I)

        qkv = jnp.dot(x, wqkv,
                      preferred_element_type=jnp.float32) + vec(base + 0, 3 * H)

        attn = vec(base + 1, H)                          # bo, broadcasts to (BS, H)
        for h in range(num_heads):                       # static unroll
            lo = h * head_dim
            q = qkv[:, lo:lo + head_dim]                 # (BS, dh), already scaled
            k = qkv[:, H + lo:H + lo + head_dim]
            v = qkv[:, 2 * H + lo:2 * H + lo + head_dim]
            s = jax.lax.dot_general(q, k, qk_dims,
                                    preferred_element_type=jnp.float32)  # (BS, BS)
            s = s + mask_bd
            s = s - jnp.max(s, axis=-1, keepdims=True)
            p = jnp.exp(s)
            p = p * pl.reciprocal(jnp.sum(p, axis=-1, keepdims=True), approx=True)
            ctx = jnp.dot(p, v, preferred_element_type=jnp.float32)      # (BS, dh)
            # ctx_full @ Wo == sum_h ctx_h @ Wo[h*dh:(h+1)*dh, :]  (no lane concat)
            attn = attn + jnp.dot(ctx, wo[lo:lo + head_dim, :],
                                  preferred_element_type=jnp.float32)

        x1 = layernorm(attn + x, vec(base + 4, H), vec(base + 5, H))
        ffn = gelu(jnp.dot(x1, wi,
                           preferred_element_type=jnp.float32) + vec(base + 2, I))
        ffn = jnp.dot(ffn, wffn_ref[l],
                      preferred_element_type=jnp.float32) + vec(base + 3, H)
        x = layernorm(ffn + x1, vec(base + 6, H), vec(base + 7, H))

    # dropout (p given at construction) is identity in eval mode.
    logits = jnp.dot(x, whead_ref[...],
                     preferred_element_type=jnp.float32) + bhead_ref[...]  # (BS, NPAD)
    logits_ref[...] = logits.astype(logits_ref.dtype)


def _fused_forward(emb, mask_bd, params, cfg):
    """emb: (B*S, H) summed embeddings; mask_bd: (B*S, B*S) additive mask.
    Returns padded, concatenated classification logits for every row (B*S, NPAD)."""
    BS, H = emb.shape
    NPAD = params["whead"].shape[1]

    kernel = functools.partial(
        _encoder_heads_kernel,
        num_layers=cfg.num_layers, num_heads=cfg.num_heads,
        head_dim=cfg.head_dim, hidden=H, intermediate=cfg.intermediate,
        eps=cfg.layer_norm_eps)

    # Single grid step: no grid / no BlockSpecs -> every operand is one whole
    # VMEM-resident block; zero per-step pipeline overhead.
    return pl.pallas_call(
        kernel,
        out_shape=jax.ShapeDtypeStruct((BS, NPAD), jnp.float32),
    )(emb, mask_bd, params["w_h"], params["w_ffn_out"], params["vec_slab"],
      params["whead"], params["bhead"])


# ----------------------------------------------------------------------------
# Parameter init (packed / fused layout)
# ----------------------------------------------------------------------------

def _init_params(key, cfg, label_map):
    H, I, L = cfg.hidden, cfg.intermediate, cfg.num_layers
    scale = 1.0 / (cfg.head_dim ** 0.5)

    def nrm(k, shape, s=0.02):
        return (s * jax.random.normal(k, shape)).astype(jnp.float32)

    keys = iter(jax.random.split(key, 64))

    word_emb = nrm(next(keys), (cfg.vocab_size, H))
    pos_emb = nrm(next(keys), (cfg.max_position, H))
    type_emb = nrm(next(keys), (cfg.type_vocab_size, H))

    # Per-layer weights, stacked along a leading L axis.
    wqkv = nrm(next(keys), (L, H, 3 * H))
    bqkv = jnp.zeros((L, 3 * H), jnp.float32)
    # Fold 1/sqrt(head_dim) into Wq / bq (removes one VPU mul per head per layer).
    wqkv = wqkv.at[:, :, :H].multiply(scale)
    bqkv = bqkv.at[:, :H].multiply(scale)
    wo = nrm(next(keys), (L, H, H))
    wi = nrm(next(keys), (L, H, I))
    wo2 = nrm(next(keys), (L, I, H))

    # Pack all row-H matrices per layer into one slab: [Wqkv | Wo | Wi].
    w_h = jnp.concatenate([wqkv, wo, wi], axis=2)        # (L, H, 3H + H + I)

    # Pack every bias / LN vector into one (rows, 3H) slab (rows zero-padded).
    VW = 3 * H

    def padrow(v):
        return jnp.zeros((VW,), jnp.float32).at[:v.shape[0]].set(v)

    rows = [padrow(jnp.ones((H,), jnp.float32)),         # 0: emb LN gamma
            padrow(jnp.zeros((H,), jnp.float32))]        # 1: emb LN beta
    for l in range(L):
        rows += [
            padrow(bqkv[l]),                             # +0 bqkv
            padrow(jnp.zeros((H,), jnp.float32)),        # +1 bo
            padrow(jnp.zeros((I,), jnp.float32)),        # +2 bi
            padrow(jnp.zeros((H,), jnp.float32)),        # +3 bo2
            padrow(jnp.ones((H,), jnp.float32)),         # +4 ln1 gamma
            padrow(jnp.zeros((H,), jnp.float32)),        # +5 ln1 beta
            padrow(jnp.ones((H,), jnp.float32)),         # +6 ln2 gamma
            padrow(jnp.zeros((H,), jnp.float32)),        # +7 ln2 beta
        ]
    vec_slab = jnp.stack(rows, axis=0)                   # (2 + 8L, 3H)

    # All per-(head, attr) Linear(hidden, n_values) weights concatenated into one
    # (H, NPAD) matrix, NPAD padded to a multiple of 128 for lane-dense stores.
    head_meta = []
    w_parts, b_parts = [], []
    off = 0
    for head_name, attrs in label_map.items():
        for attr_name, info in attrs.items():
            n = len(info["values"])
            w_parts.append(nrm(next(keys), (H, n)))
            b_parts.append(jnp.zeros((n,), jnp.float32))
            head_meta.append((head_name, attr_name, off, n, tuple(info["values"])))
            off += n
    total = off
    npad = max(128, ((total + 127) // 128) * 128)
    whead = jnp.zeros((H, npad), jnp.float32).at[:, :total].set(
        jnp.concatenate(w_parts, axis=1))
    bhead = jnp.zeros((1, npad), jnp.float32).at[0, :total].set(
        jnp.concatenate(b_parts, axis=0))

    params = {
        "word_emb": word_emb, "pos_emb": pos_emb, "type_emb": type_emb,
        "w_h": w_h, "w_ffn_out": wo2, "vec_slab": vec_slab,
        "whead": whead, "bhead": bhead,
    }
    return params, head_meta


# ----------------------------------------------------------------------------
# Model wrapper
# ----------------------------------------------------------------------------

class ChexgptLabelerPallas:
    def __init__(self, label_map, p=0.1, seed=0):
        self.label_map = label_map
        self.p = p  # dropout prob; module runs in eval -> dropout is identity
        self.cfg = Config()
        self.params, self.head_meta = _init_params(
            jax.random.PRNGKey(seed), self.cfg, label_map)

        # Static argmax metadata: attribute id per logits column (-1 = padding)
        # and segment offsets, so the per-attr argmax is ONE masked argmax.
        npad = self.params["whead"].shape[1]
        attr_ids = jnp.full((npad,), -1, jnp.int32)
        seg_off = []
        for idx, (_, _, off, n, _) in enumerate(self.head_meta):
            attr_ids = attr_ids.at[off:off + n].set(idx)
            seg_off.append(off)
        self._attr_ids = attr_ids
        self._seg_off = jnp.asarray(seg_off, jnp.int32)

        # jit the whole forward-to-logits path (one XLA program, one dispatch).
        self._jit_fwd = jax.jit(self._forward_impl)

    def _forward_impl(self, params, source_padded, attention_mask):
        cfg = self.cfg
        B, S = source_padded.shape
        BS = B * S

        # Embeddings (gather is plain-JAX glue inside the same jit program).
        tok = jnp.take(params["word_emb"], source_padded.reshape(BS), axis=0)  # (BS,H)
        pos = jnp.tile(params["pos_emb"][:S], (B, 1))                          # (BS,H)
        # TODO(synk): token_type_ids assumed all-zero (HF default when not passed).
        typ = params["type_emb"][0][None, :]                                   # (1,H)
        emb = tok + pos + typ                                                  # (BS,H)

        # Block-diagonal additive mask over the folded (B*S) key axis:
        #   same batch & valid key -> 0 ; same batch & padded key -> -10000 (HF)
        #   cross batch            -> -1e9 (exp underflows to exactly 0 in f32)
        batch_id = jnp.arange(BS, dtype=jnp.int32) // S
        same = batch_id[:, None] == batch_id[None, :]
        key_keep = attention_mask.reshape(BS).astype(jnp.float32)
        mask_bd = jnp.where(same, (1.0 - key_keep)[None, :] * -10000.0,
                            jnp.float32(-1e9)).astype(jnp.float32)

        logits_all = _fused_forward(emb, mask_bd, params, cfg)   # (BS, NPAD)
        logits_cls = logits_all[0::S]                            # (B, NPAD) CLS rows

        # Single masked argmax over all attribute segments at once.
        n_attrs = len(self.head_meta)
        sel = self._attr_ids[None, :] == jnp.arange(n_attrs, dtype=jnp.int32)[:, None]
        masked = jnp.where(sel[:, None, :], logits_cls[None, :, :], -jnp.inf)
        preds = (jnp.argmax(masked, axis=-1).astype(jnp.int32)
                 - self._seg_off[:, None])                        # (n_attrs, B)
        return logits_cls, preds

    def forward(self, source_padded, attention_mask):
        S = source_padded.shape[1]
        assert S <= self.cfg.max_position, "sequence longer than max_position"
        logits_cls, preds = self._jit_fwd(self.params, source_padded, attention_mask)
        preds_host = jax.device_get(preds)          # single host sync for all heads
        out = {head_name: {} for head_name in self.label_map}
        for idx, (head_name, attr_name, off, n, values) in enumerate(self.head_meta):
            pred_ids = [int(i) for i in preds_host[idx]]
            out[head_name][attr_name] = {
                "logits": logits_cls[:, off:off + n],
                "prediction_id": pred_ids,
                "prediction_text": [values[i] for i in pred_ids],
            }
        return out


# ----------------------------------------------------------------------------
# Demo
# ----------------------------------------------------------------------------

if __name__ == "__main__":
    label_map = {
        "lung": {
            "opacity": {"values": ["positive", "negative", "uncertain"]},
            "edema": {"values": ["yes", "no"]},
        },
        "heart": {
            "cardiomegaly": {"values": ["present", "absent", "unknown", "blank"]},
        },
    }

    model = ChexgptLabelerPallas(label_map, p=0.1, seed=0)

    B, S = 2, 8
    key = jax.random.PRNGKey(0)
    k_tok, _ = jax.random.split(key)
    # token id 0 plays the role of [CLS] at position 0.
    source_padded = jax.random.randint(k_tok, (B, S), 1, Config.vocab_size,
                                       dtype=jnp.int32)
    source_padded = source_padded.at[:, 0].set(0)
    attention_mask = jnp.ones((B, S), dtype=jnp.int32).at[1, 6:].set(0)

    out = model.forward(source_padded, attention_mask)

    # Block on every logits tensor, then report.
    for head_name, attrs in out.items():
        for attr_name, item in attrs.items():
            jax.block_until_ready(item["logits"])
    print("KERNEL_OK")
</pallas_src>

<mosaic_0001>
module attributes {stable_mosaic.version = 11 : i64} {
  func.func @_encoder_heads_kernel(%arg0: memref<16x32xf32, #tpu.memory_space<vmem>>, %arg1: memref<16x16xf32, #tpu.memory_space<vmem>>, %arg2: memref<2x32x192xf32, #tpu.memory_space<vmem>>, %arg3: memref<2x64x32xf32, #tpu.memory_space<vmem>>, %arg4: memref<18x96xf32, #tpu.memory_space<vmem>>, %arg5: memref<32x128xf32, #tpu.memory_space<vmem>>, %arg6: memref<1x128xf32, #tpu.memory_space<vmem>>, %arg7: memref<16x128xf32, #tpu.memory_space<vmem>>) attributes {dimension_semantics = [], scalar_prefetch = 0 : i64, scratch_operands = 0 : i64, tpu.core_type = #tpu.core_type<tc>} {
    %c0 = arith.constant 0 : index
    %c0_0 = arith.constant 0 : index
    %0 = vector.load %arg4[%c0, %c0_0] : memref<18x96xf32, #tpu.memory_space<vmem>>, vector<18x96xf32>
    %c0_1 = arith.constant 0 : index
    %c0_2 = arith.constant 0 : index
    %1 = vector.load %arg0[%c0_1, %c0_2] : memref<16x32xf32, #tpu.memory_space<vmem>>, vector<16x32xf32>
    %2 = vector.extract_strided_slice %0 {offsets = [0, 0], sizes = [1, 32], strides = [1, 1]} : vector<18x96xf32> to vector<1x32xf32>
    %3 = vector.extract_strided_slice %0 {offsets = [1, 0], sizes = [1, 32], strides = [1, 1]} : vector<18x96xf32> to vector<1x32xf32>
    %cst = arith.constant dense<0.000000e+00> : vector<16xf32>
    %4 = vector.multi_reduction <add>, %1, %cst [1] : vector<16x32xf32> to vector<16xf32>
    %5 = vector.shape_cast %4 : vector<16xf32> to vector<16x1xf32>
    %cst_3 = arith.constant 3.200000e+01 : f32
    %6 = vector.broadcast %cst_3 : f32 to vector<16x1xf32>
    %7 = arith.divf %5, %6 : vector<16x1xf32>
    %8 = vector.broadcast %7 : vector<16x1xf32> to vector<16x32xf32>
    %9 = arith.subf %1, %8 : vector<16x32xf32>
    %10 = arith.mulf %9, %9 : vector<16x32xf32>
    %cst_4 = arith.constant dense<0.000000e+00> : vector<16xf32>
    %11 = vector.multi_reduction <add>, %10, %cst_4 [1] : vector<16x32xf32> to vector<16xf32>
    %12 = vector.shape_cast %11 : vector<16xf32> to vector<16x1xf32>
    %cst_5 = arith.constant 3.200000e+01 : f32
    %13 = vector.broadcast %cst_5 : f32 to vector<16x1xf32>
    %14 = arith.divf %12, %13 : vector<16x1xf32>
    %15 = vector.broadcast %7 : vector<16x1xf32> to vector<16x32xf32>
    %16 = arith.subf %1, %15 : vector<16x32xf32>
    %cst_6 = arith.constant 9.99999996E-13 : f32
    %17 = vector.broadcast %cst_6 : f32 to vector<16x1xf32>
    %18 = arith.addf %14, %17 : vector<16x1xf32>
    %19 = math.rsqrt %18 : vector<16x1xf32>
    %20 = vector.broadcast %19 : vector<16x1xf32> to vector<16x32xf32>
    %21 = arith.mulf %16, %20 : vector<16x32xf32>
    %22 = vector.broadcast %2 : vector<1x32xf32> to vector<16x32xf32>
    %23 = arith.mulf %21, %22 : vector<16x32xf32>
    %24 = vector.broadcast %3 : vector<1x32xf32> to vector<16x32xf32>
    %25 = arith.addf %23, %24 : vector<16x32xf32>
    %c0_7 = arith.constant 0 : index
    %c0_8 = arith.constant 0 : index
    %26 = vector.load %arg1[%c0_7, %c0_8] : memref<16x16xf32, #tpu.memory_space<vmem>>, vector<16x16xf32>
    %c0_9 = arith.constant 0 : index
    %c0_10 = arith.constant 0 : index
    %c0_11 = arith.constant 0 : index
    %27 = vector.load %arg2[%c0_9, %c0_10, %c0_11] : memref<2x32x192xf32, #tpu.memory_space<vmem>>, vector<1x32x192xf32>
    %28 = vector.shape_cast %27 : vector<1x32x192xf32> to vector<32x192xf32>
    %29 = vector.extract_strided_slice %28 {offsets = [0, 0], sizes = [32, 96], strides = [1, 1]} : vector<32x192xf32> to vector<32x96xf32>
    %30 = vector.extract_strided_slice %28 {offsets = [0, 96], sizes = [32, 32], strides = [1, 1]} : vector<32x192xf32> to vector<32x32xf32>
    %31 = vector.extract_strided_slice %28 {offsets = [0, 128], sizes = [32, 64], strides = [1, 1]} : vector<32x192xf32> to vector<32x64xf32>
    %cst_12 = arith.constant dense<0.000000e+00> : vector<16x96xf32>
    %32 = tpu.matmul %25, %29, %cst_12 {dimension_numbers = #tpu.dot_dimension_numbers<[1], [0], [0], [1], [0, 0, 1, 1], [], []>} : vector<16x32xf32>, vector<32x96xf32>, vector<16x96xf32> -> vector<16x96xf32>
    %33 = vector.extract_strided_slice %0 {offsets = [2, 0], sizes = [1, 96], strides = [1, 1]} : vector<18x96xf32> to vector<1x96xf32>
    %34 = vector.broadcast %33 : vector<1x96xf32> to vector<16x96xf32>
    %35 = arith.addf %32, %34 : vector<16x96xf32>
    %36 = vector.extract_strided_slice %0 {offsets = [3, 0], sizes = [1, 32], strides = [1, 1]} : vector<18x96xf32> to vector<1x32xf32>
    %37 = vector.extract_strided_slice %35 {offsets = [0, 0], sizes = [16, 16], strides = [1, 1]} : vector<16x96xf32> to vector<16x16xf32>
    %38 = vector.extract_strided_slice %35 {offsets = [0, 32], sizes = [16, 16], strides = [1, 1]} : vector<16x96xf32> to vector<16x16xf32>
    %39 = vector.extract_strided_slice %35 {offsets = [0, 64], sizes = [16, 16], strides = [1, 1]} : vector<16x96xf32> to vector<16x16xf32>
    %cst_13 = arith.constant dense<0.000000e+00> : vector<16x16xf32>
    %40 = tpu.matmul %37, %38, %cst_13 {dimension_numbers = #tpu.dot_dimension_numbers<[1], [1], [0], [0], [0, 0, 1, 0], [], []>} : vector<16x16xf32>, vector<16x16xf32>, vector<16x16xf32> -> vector<16x16xf32>
    %41 = arith.addf %40, %26 : vector<16x16xf32>
    %cst_14 = arith.constant dense<0xFF800000> : vector<16xf32>
    %42 = vector.multi_reduction <maximumf>, %41, %cst_14 [1] : vector<16x16xf32> to vector<16xf32>
    %43 = vector.shape_cast %42 : vector<16xf32> to vector<16x1xf32>
    %44 = vector.broadcast %43 : vector<16x1xf32> to vector<16x16xf32>
    %45 = arith.subf %41, %44 : vector<16x16xf32>
    %46 = math.exp %45 : vector<16x16xf32>
    %cst_15 = arith.constant dense<0.000000e+00> : vector<16xf32>
    %47 = vector.multi_reduction <add>, %46, %cst_15 [1] : vector<16x16xf32> to vector<16xf32>
    %48 = vector.shape_cast %47 : vector<16xf32> to vector<16x1xf32>
    %49 = tpu.reciprocal %48 {approx = true} : vector<16x1xf32> -> vector<16x1xf32>
    %50 = vector.broadcast %49 : vector<16x1xf32> to vector<16x16xf32>
    %51 = arith.mulf %46, %50 : vector<16x16xf32>
    %cst_16 = arith.constant dense<0.000000e+00> : vector<16x16xf32>
    %52 = tpu.matmul %51, %39, %cst_16 {dimension_numbers = #tpu.dot_dimension_numbers<[1], [0], [0], [1], [0, 0, 1, 1], [], []>} : vector<16x16xf32>, vector<16x16xf32>, vector<16x16xf32> -> vector<16x16xf32>
    %53 = vector.extract_strided_slice %30 {offsets = [0, 0], sizes = [16, 32], strides = [1, 1]} : vector<32x32xf32> to vector<16x32xf32>
    %cst_17 = arith.constant dense<0.000000e+00> : vector<16x32xf32>
    %54 = tpu.matmul %52, %53, %cst_17 {dimension_numbers = #tpu.dot_dimension_numbers<[1], [0], [0], [1], [0, 0, 1, 1], [], []>} : vector<16x16xf32>, vector<16x32xf32>, vector<16x32xf32> -> vector<16x32xf32>
    %55 = vector.broadcast %36 : vector<1x32xf32> to vector<16x32xf32>
    %56 = arith.addf %55, %54 : vector<16x32xf32>
    %57 = vector.extract_strided_slice %35 {offsets = [0, 16], sizes = [16, 16], strides = [1, 1]} : vector<16x96xf32> to vector<16x16xf32>
    %58 = vector.extract_strided_slice %35 {offsets = [0, 48], sizes = [16, 16], strides = [1, 1]} : vector<16x96xf32> to vector<16x16xf32>
    %59 = vector.extract_strided_slice %35 {offsets = [0, 80], sizes = [16, 16], strides = [1, 1]} : vector<16x96xf32> to vector<16x16xf32>
    %cst_18 = arith.constant dense<0.000000e+00> : vector<16x16xf32>
    %60 = tpu.matmul %57, %58, %cst_18 {dimension_numbers = #tpu.dot_dimension_numbers<[1], [1], [0], [0], [0, 0, 1, 0], [], []>} : vector<16x16xf32>, vector<16x16xf32>, vector<16x16xf32> -> vector<16x16xf32>
    %61 = arith.addf %60, %26 : vector<16x16xf32>
    %cst_19 = arith.constant dense<0xFF800000> : vector<16xf32>
    %62 = vector.multi_reduction <maximumf>, %61, %cst_19 [1] : vector<16x16xf32> to vector<16xf32>
    %63 = vector.shape_cast %62 : vector<16xf32> to vector<16x1xf32>
    %64 = vector.broadcast %63 : vector<16x1xf32> to vector<16x16xf32>
    %65 = arith.subf %61, %64 : vector<16x16xf32>
    %66 = math.exp %65 : vector<16x16xf32>
    %cst_20 = arith.constant dense<0.000000e+00> : vector<16xf32>
    %67 = vector.multi_reduction <add>, %66, %cst_20 [1] : vector<16x16xf32> to vector<16xf32>
    %68 = vector.shape_cast %67 : vector<16xf32> to vector<16x1xf32>
    %69 = tpu.reciprocal %68 {approx = true} : vector<16x1xf32> -> vector<16x1xf32>
    %70 = vector.broadcast %69 : vector<16x1xf32> to vector<16x16xf32>
    %71 = arith.mulf %66, %70 : vector<16x16xf32>
    %cst_21 = arith.constant dense<0.000000e+00> : vector<16x16xf32>
    %72 = tpu.matmul %71, %59, %cst_21 {dimension_numbers = #tpu.dot_dimension_numbers<[1], [0], [0], [1], [0, 0, 1, 1], [], []>} : vector<16x16xf32>, vector<16x16xf32>, vector<16x16xf32> -> vector<16x16xf32>
    %73 = vector.extract_strided_slice %30 {offsets = [16, 0], sizes = [16, 32], strides = [1, 1]} : vector<32x32xf32> to vector<16x32xf32>
    %cst_22 = arith.constant dense<0.000000e+00> : vector<16x32xf32>
    %74 = tpu.matmul %72, %73, %cst_22 {dimension_numbers = #tpu.dot_dimension_numbers<[1], [0], [0], [1], [0, 0, 1, 1], [], []>} : vector<16x16xf32>, vector<16x32xf32>, vector<16x32xf32> -> vector<16x32xf32>
    %75 = arith.addf %56, %74 : vector<16x32xf32>
    %76 = arith.addf %75, %25 : vector<16x32xf32>
    %77 = vector.extract_strided_slice %0 {offsets = [6, 0], sizes = [1, 32], strides = [1, 1]} : vector<18x96xf32> to vector<1x32xf32>
    %78 = vector.extract_strided_slice %0 {offsets = [7, 0], sizes = [1, 32], strides = [1, 1]} : vector<18x96xf32> to vector<1x32xf32>
    %cst_23 = arith.constant dense<0.000000e+00> : vector<16xf32>
    %79 = vector.multi_reduction <add>, %76, %cst_23 [1] : vector<16x32xf32> to vector<16xf32>
    %80 = vector.shape_cast %79 : vector<16xf32> to vector<16x1xf32>
    %cst_24 = arith.constant 3.200000e+01 : f32
    %81 = vector.broadcast %cst_24 : f32 to vector<16x1xf32>
    %82 = arith.divf %80, %81 : vector<16x1xf32>
    %83 = vector.broadcast %82 : vector<16x1xf32> to vector<16x32xf32>
    %84 = arith.subf %76, %83 : vector<16x32xf32>
    %85 = arith.mulf %84, %84 : vector<16x32xf32>
    %cst_25 = arith.constant dense<0.000000e+00> : vector<16xf32>
    %86 = vector.multi_reduction <add>, %85, %cst_25 [1] : vector<16x32xf32> to vector<16xf32>
    %87 = vector.shape_cast %86 : vector<16xf32> to vector<16x1xf32>
    %cst_26 = arith.constant 3.200000e+01 : f32
    %88 = vector.broadcast %cst_26 : f32 to vector<16x1xf32>
    %89 = arith.divf %87, %88 : vector<16x1xf32>
    %90 = vector.broadcast %82 : vector<16x1xf32> to vector<16x32xf32>
    %91 = arith.subf %76, %90 : vector<16x32xf32>
    %cst_27 = arith.constant 9.99999996E-13 : f32
    %92 = vector.broadcast %cst_27 : f32 to vector<16x1xf32>
    %93 = arith.addf %89, %92 : vector<16x1xf32>
    %94 = math.rsqrt %93 : vector<16x1xf32>
    %95 = vector.broadcast %94 : vector<16x1xf32> to vector<16x32xf32>
    %96 = arith.mulf %91, %95 : vector<16x32xf32>
    %97 = vector.broadcast %77 : vector<1x32xf32> to vector<16x32xf32>
    %98 = arith.mulf %96, %97 : vector<16x32xf32>
    %99 = vector.broadcast %78 : vector<1x32xf32> to vector<16x32xf32>
    %100 = arith.addf %98, %99 : vector<16x32xf32>
    %cst_28 = arith.constant dense<0.000000e+00> : vector<16x64xf32>
    %101 = tpu.matmul %100, %31, %cst_28 {dimension_numbers = #tpu.dot_dimension_numbers<[1], [0], [0], [1], [0, 0, 1, 1], [], []>} : vector<16x32xf32>, vector<32x64xf32>, vector<16x64xf32> -> vector<16x64xf32>
    %102 = vector.extract_strided_slice %0 {offsets = [4, 0], sizes = [1, 64], strides = [1, 1]} : vector<18x96xf32> to vector<1x64xf32>
    %103 = vector.broadcast %102 : vector<1x64xf32> to vector<16x64xf32>
    %104 = arith.addf %101, %103 : vector<16x64xf32>
    %cst_29 = arith.constant 5.000000e-01 : f32
    %105 = vector.broadcast %cst_29 : f32 to vector<16x64xf32>
    %106 = arith.mulf %104, %105 : vector<16x64xf32>
    %cst_30 = arith.constant 0.707106769 : f32
    %107 = vector.broadcast %cst_30 : f32 to vector<16x64xf32>
    %108 = arith.mulf %104, %107 : vector<16x64xf32>
    %109 = math.erf %108 : vector<16x64xf32>
    %cst_31 = arith.constant 1.000000e+00 : f32
    %110 = vector.broadcast %cst_31 : f32 to vector<16x64xf32>
    %111 = arith.addf %110, %109 : vector<16x64xf32>
    %112 = arith.mulf %106, %111 : vector<16x64xf32>
    %c0_32 = arith.constant 0 : index
    %c0_33 = arith.constant 0 : index
    %c0_34 = arith.constant 0 : index
    %113 = vector.load %arg3[%c0_32, %c0_33, %c0_34] : memref<2x64x32xf32, #tpu.memory_space<vmem>>, vector<1x64x32xf32>
    %114 = vector.shape_cast %113 : vector<1x64x32xf32> to vector<64x32xf32>
    %cst_35 = arith.constant dense<0.000000e+00> : vector<16x32xf32>
    %115 = tpu.matmul %112, %114, %cst_35 {dimension_numbers = #tpu.dot_dimension_numbers<[1], [0], [0], [1], [0, 0, 1, 1], [], []>} : vector<16x64xf32>, vector<64x32xf32>, vector<16x32xf32> -> vector<16x32xf32>
    %116 = vector.extract_strided_slice %0 {offsets = [5, 0], sizes = [1, 32], strides = [1, 1]} : vector<18x96xf32> to vector<1x32xf32>
    %117 = vector.broadcast %116 : vector<1x32xf32> to vector<16x32xf32>
    %118 = arith.addf %115, %117 : vector<16x32xf32>
    %119 = arith.addf %118, %100 : vector<16x32xf32>
    %120 = vector.extract_strided_slice %0 {offsets = [8, 0], sizes = [1, 32], strides = [1, 1]} : vector<18x96xf32> to vector<1x32xf32>
    %121 = vector.extract_strided_slice %0 {offsets = [9, 0], sizes = [1, 32], strides = [1, 1]} : vector<18x96xf32> to vector<1x32xf32>
    %cst_36 = arith.constant dense<0.000000e+00> : vector<16xf32>
    %122 = vector.multi_reduction <add>, %119, %cst_36 [1] : vector<16x32xf32> to vector<16xf32>
    %123 = vector.shape_cast %122 : vector<16xf32> to vector<16x1xf32>
    %cst_37 = arith.constant 3.200000e+01 : f32
    %124 = vector.broadcast %cst_37 : f32 to vector<16x1xf32>
    %125 = arith.divf %123, %124 : vector<16x1xf32>
    %126 = vector.broadcast %125 : vector<16x1xf32> to vector<16x32xf32>
    %127 = arith.subf %119, %126 : vector<16x32xf32>
    %128 = arith.mulf %127, %127 : vector<16x32xf32>
    %cst_38 = arith.constant dense<0.000000e+00> : vector<16xf32>
    %129 = vector.multi_reduction <add>, %128, %cst_38 [1] : vector<16x32xf32> to vector<16xf32>
    %130 = vector.shape_cast %129 : vector<16xf32> to vector<16x1xf32>
    %cst_39 = arith.constant 3.200000e+01 : f32
    %131 = vector.broadcast %cst_39 : f32 to vector<16x1xf32>
    %132 = arith.divf %130, %131 : vector<16x1xf32>
    %133 = vector.broadcast %125 : vector<16x1xf32> to vector<16x32xf32>
    %134 = arith.subf %119, %133 : vector<16x32xf32>
    %cst_40 = arith.constant 9.99999996E-13 : f32
    %135 = vector.broadcast %cst_40 : f32 to vector<16x1xf32>
    %136 = arith.addf %132, %135 : vector<16x1xf32>
    %137 = math.rsqrt %136 : vector<16x1xf32>
    %138 = vector.broadcast %137 : vector<16x1xf32> to vector<16x32xf32>
    %139 = arith.mulf %134, %138 : vector<16x32xf32>
    %140 = vector.broadcast %120 : vector<1x32xf32> to vector<16x32xf32>
    %141 = arith.mulf %139, %140 : vector<16x32xf32>
    %142 = vector.broadcast %121 : vector<1x32xf32> to vector<16x32xf32>
    %143 = arith.addf %141, %142 : vector<16x32xf32>
    %c1 = arith.constant 1 : index
    %c0_41 = arith.constant 0 : index
    %c0_42 = arith.constant 0 : index
    %144 = vector.load %arg2[%c1, %c0_41, %c0_42] : memref<2x32x192xf32, #tpu.memory_space<vmem>>, vector<1x32x192xf32>
    %145 = vector.shape_cast %144 : vector<1x32x192xf32> to vector<32x192xf32>
    %146 = vector.extract_strided_slice %145 {offsets = [0, 0], sizes = [32, 96], strides = [1, 1]} : vector<32x192xf32> to vector<32x96xf32>
    %147 = vector.extract_strided_slice %145 {offsets = [0, 96], sizes = [32, 32], strides = [1, 1]} : vector<32x192xf32> to vector<32x32xf32>
    %148 = vector.extract_strided_slice %145 {offsets = [0, 128], sizes = [32, 64], strides = [1, 1]} : vector<32x192xf32> to vector<32x64xf32>
    %cst_43 = arith.constant dense<0.000000e+00> : vector<16x96xf32>
    %149 = tpu.matmul %143, %146, %cst_43 {dimension_numbers = #tpu.dot_dimension_numbers<[1], [0], [0], [1], [0, 0, 1, 1], [], []>} : vector<16x32xf32>, vector<32x96xf32>, vector<16x96xf32> -> vector<16x96xf32>
    %150 = vector.extract_strided_slice %0 {offsets = [10, 0], sizes = [1, 96], strides = [1, 1]} : vector<18x96xf32> to vector<1x96xf32>
    %151 = vector.broadcast %150 : vector<1x96xf32> to vector<16x96xf32>
    %152 = arith.addf %149, %151 : vector<16x96xf32>
    %153 = vector.extract_strided_slice %0 {offsets = [11, 0], sizes = [1, 32], strides = [1, 1]} : vector<18x96xf32> to vector<1x32xf32>
    %154 = vector.extract_strided_slice %152 {offsets = [0, 0], sizes = [16, 16], strides = [1, 1]} : vector<16x96xf32> to vector<16x16xf32>
    %155 = vector.extract_strided_slice %152 {offsets = [0, 32], sizes = [16, 16], strides = [1, 1]} : vector<16x96xf32> to vector<16x16xf32>
    %156 = vector.extract_strided_slice %152 {offsets = [0, 64], sizes = [16, 16], strides = [1, 1]} : vector<16x96xf32> to vector<16x16xf32>
    %cst_44 = arith.constant dense<0.000000e+00> : vector<16x16xf32>
    %157 = tpu.matmul %154, %155, %cst_44 {dimension_numbers = #tpu.dot_dimension_numbers<[1], [1], [0], [0], [0, 0, 1, 0], [], []>} : vector<16x16xf32>, vector<16x16xf32>, vector<16x16xf32> -> vector<16x16xf32>
    %158 = arith.addf %157, %26 : vector<16x16xf32>
    %cst_45 = arith.constant dense<0xFF800000> : vector<16xf32>
    %159 = vector.multi_reduction <maximumf>, %158, %cst_45 [1] : vector<16x16xf32> to vector<16xf32>
    %160 = vector.shape_cast %159 : vector<16xf32> to vector<16x1xf32>
    %161 = vector.broadcast %160 : vector<16x1xf32> to vector<16x16xf32>
    %162 = arith.subf %158, %161 : vector<16x16xf32>
    %163 = math.exp %162 : vector<16x16xf32>
    %cst_46 = arith.constant dense<0.000000e+00> : vector<16xf32>
    %164 = vector.multi_reduction <add>, %163, %cst_46 [1] : vector<16x16xf32> to vector<16xf32>
    %165 = vector.shape_cast %164 : vector<16xf32> to vector<16x1xf32>
    %166 = tpu.reciprocal %165 {approx = true} : vector<16x1xf32> -> vector<16x1xf32>
    %167 = vector.broadcast %166 : vector<16x1xf32> to vector<16x16xf32>
    %168 = arith.mulf %163, %167 : vector<16x16xf32>
    %cst_47 = arith.constant dense<0.000000e+00> : vector<16x16xf32>
    %169 = tpu.matmul %168, %156, %cst_47 {dimension_numbers = #tpu.dot_dimension_numbers<[1], [0], [0], [1], [0, 0, 1, 1], [], []>} : vector<16x16xf32>, vector<16x16xf32>, vector<16x16xf32> -> vector<16x16xf32>
    %170 = vector.extract_strided_slice %147 {offsets = [0, 0], sizes = [16, 32], strides = [1, 1]} : vector<32x32xf32> to vector<16x32xf32>
    %cst_48 = arith.constant dense<0.000000e+00> : vector<16x32xf32>
    %171 = tpu.matmul %169, %170, %cst_48 {dimension_numbers = #tpu.dot_dimension_numbers<[1], [0], [0], [1], [0, 0, 1, 1], [], []>} : vector<16x16xf32>, vector<16x32xf32>, vector<16x32xf32> -> vector<16x32xf32>
    %172 = vector.broadcast %153 : vector<1x32xf32> to vector<16x32xf32>
    %173 = arith.addf %172, %171 : vector<16x32xf32>
    %174 = vector.extract_strided_slice %152 {offsets = [0, 16], sizes = [16, 16], strides = [1, 1]} : vector<16x96xf32> to vector<16x16xf32>
    %175 = vector.extract_strided_slice %152 {offsets = [0, 48], sizes = [16, 16], strides = [1, 1]} : vector<16x96xf32> to vector<16x16xf32>
    %176 = vector.extract_strided_slice %152 {offsets = [0, 80], sizes = [16, 16], strides = [1, 1]} : vector<16x96xf32> to vector<16x16xf32>
    %cst_49 = arith.constant dense<0.000000e+00> : vector<16x16xf32>
    %177 = tpu.matmul %174, %175, %cst_49 {dimension_numbers = #tpu.dot_dimension_numbers<[1], [1], [0], [0], [0, 0, 1, 0], [], []>} : vector<16x16xf32>, vector<16x16xf32>, vector<16x16xf32> -> vector<16x16xf32>
    %178 = arith.addf %177, %26 : vector<16x16xf32>
    %cst_50 = arith.constant dense<0xFF800000> : vector<16xf32>
    %179 = vector.multi_reduction <maximumf>, %178, %cst_50 [1] : vector<16x16xf32> to vector<16xf32>
    %180 = vector.shape_cast %179 : vector<16xf32> to vector<16x1xf32>
    %181 = vector.broadcast %180 : vector<16x1xf32> to vector<16x16xf32>
    %182 = arith.subf %178, %181 : vector<16x16xf32>
    %183 = math.exp %182 : vector<16x16xf32>
    %cst_51 = arith.constant dense<0.000000e+00> : vector<16xf32>
    %184 = vector.multi_reduction <add>, %183, %cst_51 [1] : vector<16x16xf32> to vector<16xf32>
    %185 = vector.shape_cast %184 : vector<16xf32> to vector<16x1xf32>
    %186 = tpu.reciprocal %185 {approx = true} : vector<16x1xf32> -> vector<16x1xf32>
    %187 = vector.broadcast %186 : vector<16x1xf32> to vector<16x16xf32>
    %188 = arith.mulf %183, %187 : vector<16x16xf32>
    %cst_52 = arith.constant dense<0.000000e+00> : vector<16x16xf32>
    %189 = tpu.matmul %188, %176, %cst_52 {dimension_numbers = #tpu.dot_dimension_numbers<[1], [0], [0], [1], [0, 0, 1, 1], [], []>} : vector<16x16xf32>, vector<16x16xf32>, vector<16x16xf32> -> vector<16x16xf32>
    %190 = vector.extract_strided_slice %147 {offsets = [16, 0], sizes = [16, 32], strides = [1, 1]} : vector<32x32xf32> to vector<16x32xf32>
    %cst_53 = arith.constant dense<0.000000e+00> : vector<16x32xf32>
    %191 = tpu.matmul %189, %190, %cst_53 {dimension_numbers = #tpu.dot_dimension_numbers<[1], [0], [0], [1], [0, 0, 1, 1], [], []>} : vector<16x16xf32>, vector<16x32xf32>, vector<16x32xf32> -> vector<16x32xf32>
    %192 = arith.addf %173, %191 : vector<16x32xf32>
    %193 = arith.addf %192, %143 : vector<16x32xf32>
    %194 = vector.extract_strided_slice %0 {offsets = [14, 0], sizes = [1, 32], strides = [1, 1]} : vector<18x96xf32> to vector<1x32xf32>
    %195 = vector.extract_strided_slice %0 {offsets = [15, 0], sizes = [1, 32], strides = [1, 1]} : vector<18x96xf32> to vector<1x32xf32>
    %cst_54 = arith.constant dense<0.000000e+00> : vector<16xf32>
    %196 = vector.multi_reduction <add>, %193, %cst_54 [1] : vector<16x32xf32> to vector<16xf32>
    %197 = vector.shape_cast %196 : vector<16xf32> to vector<16x1xf32>
    %cst_55 = arith.constant 3.200000e+01 : f32
    %198 = vector.broadcast %cst_55 : f32 to vector<16x1xf32>
    %199 = arith.divf %197, %198 : vector<16x1xf32>
    %200 = vector.broadcast %199 : vector<16x1xf32> to vector<16x32xf32>
    %201 = arith.subf %193, %200 : vector<16x32xf32>
    %202 = arith.mulf %201, %201 : vector<16x32xf32>
    %cst_56 = arith.constant dense<0.000000e+00> : vector<16xf32>
    %203 = vector.multi_reduction <add>, %202, %cst_56 [1] : vector<16x32xf32> to vector<16xf32>
    %204 = vector.shape_cast %203 : vector<16xf32> to vector<16x1xf32>
    %cst_57 = arith.constant 3.200000e+01 : f32
    %205 = vector.broadcast %cst_57 : f32 to vector<16x1xf32>
    %206 = arith.divf %204, %205 : vector<16x1xf32>
    %207 = vector.broadcast %199 : vector<16x1xf32> to vector<16x32xf32>
    %208 = arith.subf %193, %207 : vector<16x32xf32>
    %cst_58 = arith.constant 9.99999996E-13 : f32
    %209 = vector.broadcast %cst_58 : f32 to vector<16x1xf32>
    %210 = arith.addf %206, %209 : vector<16x1xf32>
    %211 = math.rsqrt %210 : vector<16x1xf32>
    %212 = vector.broadcast %211 : vector<16x1xf32> to vector<16x32xf32>
    %213 = arith.mulf %208, %212 : vector<16x32xf32>
    %214 = vector.broadcast %194 : vector<1x32xf32> to vector<16x32xf32>
    %215 = arith.mulf %213, %214 : vector<16x32xf32>
    %216 = vector.broadcast %195 : vector<1x32xf32> to vector<16x32xf32>
    %217 = arith.addf %215, %216 : vector<16x32xf32>
    %cst_59 = arith.constant dense<0.000000e+00> : vector<16x64xf32>
    %218 = tpu.matmul %217, %148, %cst_59 {dimension_numbers = #tpu.dot_dimension_numbers<[1], [0], [0], [1], [0, 0, 1, 1], [], []>} : vector<16x32xf32>, vector<32x64xf32>, vector<16x64xf32> -> vector<16x64xf32>
    %219 = vector.extract_strided_slice %0 {offsets = [12, 0], sizes = [1, 64], strides = [1, 1]} : vector<18x96xf32> to vector<1x64xf32>
    %220 = vector.broadcast %219 : vector<1x64xf32> to vector<16x64xf32>
    %221 = arith.addf %218, %220 : vector<16x64xf32>
    %cst_60 = arith.constant 5.000000e-01 : f32
    %222 = vector.broadcast %cst_60 : f32 to vector<16x64xf32>
    %223 = arith.mulf %221, %222 : vector<16x64xf32>
    %cst_61 = arith.constant 0.707106769 : f32
    %224 = vector.broadcast %cst_61 : f32 to vector<16x64xf32>
    %225 = arith.mulf %221, %224 : vector<16x64xf32>
    %226 = math.erf %225 : vector<16x64xf32>
    %cst_62 = arith.constant 1.000000e+00 : f32
    %227 = vector.broadcast %cst_62 : f32 to vector<16x64xf32>
    %228 = arith.addf %227, %226 : vector<16x64xf32>
    %229 = arith.mulf %223, %228 : vector<16x64xf32>
    %c1_63 = arith.constant 1 : index
    %c0_64 = arith.constant 0 : index
    %c0_65 = arith.constant 0 : index
    %230 = vector.load %arg3[%c1_63, %c0_64, %c0_65] : memref<2x64x32xf32, #tpu.memory_space<vmem>>, vector<1x64x32xf32>
    %231 = vector.shape_cast %230 : vector<1x64x32xf32> to vector<64x32xf32>
    %cst_66 = arith.constant dense<0.000000e+00> : vector<16x32xf32>
    %232 = tpu.matmul %229, %231, %cst_66 {dimension_numbers = #tpu.dot_dimension_numbers<[1], [0], [0], [1], [0, 0, 1, 1], [], []>} : vector<16x64xf32>, vector<64x32xf32>, vector<16x32xf32> -> vector<16x32xf32>
    %233 = vector.extract_strided_slice %0 {offsets = [13, 0], sizes = [1, 32], strides = [1, 1]} : vector<18x96xf32> to vector<1x32xf32>
    %234 = vector.broadcast %233 : vector<1x32xf32> to vector<16x32xf32>
    %235 = arith.addf %232, %234 : vector<16x32xf32>
    %236 = arith.addf %235, %217 : vector<16x32xf32>
    %237 = vector.extract_strided_slice %0 {offsets = [16, 0], sizes = [1, 32], strides = [1, 1]} : vector<18x96xf32> to vector<1x32xf32>
    %238 = vector.extract_strided_slice %0 {offsets = [17, 0], sizes = [1, 32], strides = [1, 1]} : vector<18x96xf32> to vector<1x32xf32>
    %cst_67 = arith.constant dense<0.000000e+00> : vector<16xf32>
    %239 = vector.multi_reduction <add>, %236, %cst_67 [1] : vector<16x32xf32> to vector<16xf32>
    %240 = vector.shape_cast %239 : vector<16xf32> to vector<16x1xf32>
    %cst_68 = arith.constant 3.200000e+01 : f32
    %241 = vector.broadcast %cst_68 : f32 to vector<16x1xf32>
    %242 = arith.divf %240, %241 : vector<16x1xf32>
    %243 = vector.broadcast %242 : vector<16x1xf32> to vector<16x32xf32>
    %244 = arith.subf %236, %243 : vector<16x32xf32>
    %245 = arith.mulf %244, %244 : vector<16x32xf32>
    %cst_69 = arith.constant dense<0.000000e+00> : vector<16xf32>
    %246 = vector.multi_reduction <add>, %245, %cst_69 [1] : vector<16x32xf32> to vector<16xf32>
    %247 = vector.shape_cast %246 : vector<16xf32> to vector<16x1xf32>
    %cst_70 = arith.constant 3.200000e+01 : f32
    %248 = vector.broadcast %cst_70 : f32 to vector<16x1xf32>
    %249 = arith.divf %247, %248 : vector<16x1xf32>
    %250 = vector.broadcast %242 : vector<16x1xf32> to vector<16x32xf32>
    %251 = arith.subf %236, %250 : vector<16x32xf32>
    %cst_71 = arith.constant 9.99999996E-13 : f32
    %252 = vector.broadcast %cst_71 : f32 to vector<16x1xf32>
    %253 = arith.addf %249, %252 : vector<16x1xf32>
    %254 = math.rsqrt %253 : vector<16x1xf32>
    %255 = vector.broadcast %254 : vector<16x1xf32> to vector<16x32xf32>
    %256 = arith.mulf %251, %255 : vector<16x32xf32>
    %257 = vector.broadcast %237 : vector<1x32xf32> to vector<16x32xf32>
    %258 = arith.mulf %256, %257 : vector<16x32xf32>
    %259 = vector.broadcast %238 : vector<1x32xf32> to vector<16x32xf32>
    %260 = arith.addf %258, %259 : vector<16x32xf32>
    %c0_72 = arith.constant 0 : index
    %c0_73 = arith.constant 0 : index
    %261 = vector.load %arg5[%c0_72, %c0_73] : memref<32x128xf32, #tpu.memory_space<vmem>>, vector<32x128xf32>
    %cst_74 = arith.constant dense<0.000000e+00> : vector<16x128xf32>
    %262 = tpu.matmul %260, %261, %cst_74 {dimension_numbers = #tpu.dot_dimension_numbers<[1], [0], [0], [1], [0, 0, 1, 1], [], []>} : vector<16x32xf32>, vector<32x128xf32>, vector<16x128xf32> -> vector<16x128xf32>
    %c0_75 = arith.constant 0 : index
    %c0_76 = arith.constant 0 : index
    %263 = vector.load %arg6[%c0_75, %c0_76] : memref<1x128xf32, #tpu.memory_space<vmem>>, vector<1x128xf32>
    %264 = vector.broadcast %263 : vector<1x128xf32> to vector<16x128xf32>
    %265 = arith.addf %262, %264 : vector<16x128xf32>
    %c0_77 = arith.constant 0 : index
    %c0_78 = arith.constant 0 : index
    %266 = vector.load %arg7[%c0_77, %c0_78] : memref<16x128xf32, #tpu.memory_space<vmem>>, vector<16x128xf32>
    tpu.vector_store %arg7[%c0_77, %c0_78], %265 {strides = array<i32>} : memref<16x128xf32, #tpu.memory_space<vmem>>, vector<16x128xf32>,
    return
  }
}

</mosaic_0001>

<bundles_post_ra>
// kernel: _forward_impl.1
= control target key start
LH: loop header
LB: loop body
LE: loop exit
PB: predicated region body
PF: predicated region fallthrough
CT: control target
= control target key end

     0   :  { %vm31_vm0 = vcmask 261120   ;;  %v1452_v4 = vmov 32.0   ;;  %s1453_s14 = smov 96   ;;  %vm135_vm8 = vcmask 130048   ;;  %s1454_s19 = smov 64   ;;  %s1903_s0 = inlined_call_operand.vmem [shape: f32[16,32], index: 0, kind: input, shape index: {}]   ;;  %s1904_s2 = inlined_call_operand.vmem [shape: f32[2,32,192], index: 2, kind: input, shape index: {}]   ;;  %s1905_s4 = inlined_call_operand.vmem [shape: f32[18,96], index: 4, kind: input, shape index: {}]   ;;  %s1906_s1 = inlined_call_operand.vmem [shape: f32[16,16], index: 1, kind: input, shape index: {}]   ;;  %s1907_s3 = inlined_call_operand.vmem [shape: f32[2,64,32], index: 3, kind: input, shape index: {}]   ;;  %s1908_s6 = inlined_call_operand.vmem [shape: f32[1,128], index: 6, kind: input, shape index: {}]   ;;  %s1909_s5 = inlined_call_operand.vmem [shape: f32[32,128], index: 5, kind: input, shape index: {}]   ;;  %s1910_s7 = inlined_call_operand.vmem [shape: f32[16,128], index: 7, kind: output, shape index: {}]  }
   0x1   :  { %v30_v0 = vld [vmem:[%s1903_s0 + $0x8] sm:$0xff]  ;;  %v29_v2 = vld [vmem:[%s1903_s0] sm:$0xff]  ;;  %1390 = vrcp.f32 %v1452_v4  ;;  %v1516_v21 = vld [vmem:[%s1904_s2 + $0x30] sm:$0xff]  ;;  %s1455_s20 = smov 80   ;;  %s1456_s21 = smov 112  }
   0x2   :  { %v35_v1 = vsel %vm31_vm0, %v30_v0, 0.0  ;;  %v32_v3 = vsel %vm31_vm0, %v29_v2, 0.0  ;;  %1338 = vmatpush.msra.mxu1 %v1516_v21  ;;  %118 = vmatpush.msra.mxu0 %v1516_v21  ;;  %v1523_v22 = vld [vmem:[%s1904_s2 + $0x20] sm:$0xff]  ;;  %v1530_v23 = vld [vmem:[%s1904_s2 + $0x10] sm:$0xff]  ;;  %s1458_s22 = smov 48  }
   0x3   :  { %36 = vadd.xlane.f32.xlu0 %v35_v1  ;;  %v1537_v24 = vld [vmem:[%s1904_s2] sm:$0xff]  ;;  %v1575_v1 = vld [vmem:[%s1906_s1 + $0x8] sm:$0xff] }
   0x4   :  { %1339 = vmatpush.msra.mxu1 %v1523_v22  ;;  %119 = vmatpush.msra.mxu0 %v1523_v22  ;;  %v1546_v36 = vld [vmem:[%s1905_s4] sm:$0xff] }
   0x5   :  { %v83_v40 = vperm.slane %v1546_v36, 0  ;;  %v86_v44 = vperm.slane %v1546_v36, 1  ;;  %v99_v54 = vperm.slane %v1546_v36, 2  ;;  %v1568_v61 = vld [vmem:[%s1906_s1] sm:$0xff]  ;;  %s1457_s1 = smov 32  }
   0x6   :  { %1340 = vmatpush.msra.mxu1 %v1530_v23  ;;  %120 = vmatpush.msra.mxu0 %v1530_v23 }
   0x7   :  { %v1391_v5 = vpop.eup %1390 }
   0x8   :  { %v39_v6 = vmul.f32 32.0, %v1391_v5  ;;  %vm43_vm1 = vweird.f32 %v1391_v5  ;;  %1341 = vmatpush.msra.mxu1 %v1537_v24  ;;  %121 = vmatpush.msra.mxu0 %v1537_v24 }
   0xa   :  { %v40_v7 = vsub.f32 1.0, %v39_v6 }
   0xb   :  { %33 = vadd.xlane.f32.xlu0 %v32_v3 }
   0xc   :  { %v41_v8 = vmul.f32 %v1391_v5, %v40_v7 }
   0xe   :  { %v42_v9 = vadd.f32 %v1391_v5, %v41_v8 }
  0x10   :  { %v1507_v10 = vsel %vm43_vm1, %v1391_v5, %v42_v9 }
  0x76   :  { %v37_v11 = vpop.xlane.xlu0 %36 }
  0x77   :  { %v46_v12 = vmul.f32 %v1507_v10, %v37_v11 }
  0x79   :  { %v48_v13 = vsub.f32 %v30_v0, %v46_v12 }
  0x7b   :  { %v50_v14 = vmul.f32 %v48_v13, %v48_v13 }
  0x7d   :  { %v54_v15 = vsel %vm31_vm0, %v50_v14, 0.0 }
  0x7e   :  { %55 = vadd.xlane.f32.xlu1 %v54_v15  ;;  %v34_v16 = vpop.xlane.xlu0 %33 }
  0x7f   :  { %v45_v17 = vmul.f32 %v1507_v10, %v34_v16 }
  0x81   :  { %v47_v18 = vsub.f32 %v29_v2, %v45_v17 }
  0x83   :  { %v49_v19 = vmul.f32 %v47_v18, %v47_v18 }
  0x85   :  { %v51_v20 = vsel %vm31_vm0, %v49_v19, 0.0 }
  0x86   :  { %52 = vadd.xlane.f32.xlu1 %v51_v20 }
  0xf1   :  { %v56_v25 = vpop.xlane.xlu1 %55 }
  0xf2   :  { %v58_v26 = vmul.f32 %v56_v25, %v1507_v10 }
  0xf4   :  { %v60_v27 = vadd.f32 1e-12, %v58_v26  ;;  %v1354_v26 = vpack.i.bf16 %v1537_v24, %v1530_v23 }
  0xf6   :  { %1392 = vrsqrt.f32 %v60_v27  ;;  %vm77_vm3 = vweird.f32 %v60_v27 }
  0xf9   :  { %v53_v28 = vpop.xlane.xlu1 %52 }
  0xfa   :  { %v57_v29 = vmul.f32 %v53_v28, %v1507_v10 }
  0xfc   :  { %v1393_v30 = vpop.eup %1392  ;;  %v59_v31 = vadd.f32 1e-12, %v57_v29 }
  0xfd   :  { %v72_v32 = vmul.f32 %v1393_v30, %v60_v27  ;;  %vm78_vm2 = vweird.f32 %v1393_v30 }
  0xfe   :  { %1394 = vrsqrt.f32 %v59_v31  ;;  %vm79_vm4 = vmor %vm77_vm3, %vm78_vm2  ;;  %vm67_vm6 = vweird.f32 %v59_v31 }
  0xff   :  { %v73_v33 = vmul.f32 %v1393_v30, %v72_v32 }
 0x101   :  { %v74_v34 = vmul.f32 0.5, %v73_v33 }
 0x103   :  { %v75_v35 = vsub.f32 1.5, %v74_v34 }
 0x104   :  { %v1395_v37 = vpop.eup %1394 }
 0x105   :  { %v76_v38 = vmul.f32 %v1393_v30, %v75_v35  ;;  %v62_v39 = vmul.f32 %v1395_v37, %v59_v31  ;;  %vm68_vm5 = vweird.f32 %v1395_v37 }
 0x106   :  { %vm69_vm7 = vmor %vm67_vm6, %vm68_vm5  ;;  %vm578_vm6 = vcmask 523264  }
 0x107   :  { %v80_v41 = vsel %vm79_vm4, %v1393_v30, %v76_v38  ;;  %v63_v42 = vmul.f32 %v1395_v37, %v62_v39 }
 0x108   :  { %v82_v43 = vmul.f32 %v80_v41, %v48_v13 }
 0x109   :  { %v64_v45 = vmul.f32 0.5, %v63_v42 }
 0x10a   :  { %v85_v46 = vmul.f32 %v83_v40, %v82_v43 }
 0x10b   :  { %v65_v47 = vsub.f32 1.5, %v64_v45 }
 0x10c   :  { %v1550_v48 = vadd.f32 %v86_v44, %v85_v46 }
 0x10d   :  { %v66_v49 = vmul.f32 %v1395_v37, %v65_v47 }
 0x10e   :  { %1273 = vmatmul.msk.f32.vlgmr.msra.gmra.mxu1 %vm31_vm0, %v1550_v48 }
 0x10f   :  { %v70_v50 = vsel %vm69_vm7, %v1395_v37, %v66_v49 }
 0x110   :  { %v81_v51 = vmul.f32 %v70_v50, %v47_v18 }
 0x112   :  { %v84_v52 = vmul.f32 %v83_v40, %v81_v51 }
 0x114   :  { %v1554_v53 = vadd.f32 %v86_v44, %v84_v52 }
 0x116   :  { %1272 = vmatmul.msk.f32.vlgmr.msra.gmra.mxu0 %vm31_vm0, %v1554_v53 }
 0x18b   :  { %v126_v55 = vpop.f32.mrf.mxu1 }
 0x18c   :  { %v127_v56 = vadd.f32 %v126_v55, %v99_v54 }
 0x18e   :  { %133 = vrot.lane.b32.xlu2 %v127_v56, %s1453_s14 }
 0x193   :  { %v123_v57 = vpop.f32.mrf.mxu0 }
 0x194   :  { %v124_v58 = vadd.f32 %v123_v57, %v99_v54 }
 0x196   :  { %131 = vrot.lane.b32.xlu2 %v124_v58, %s1453_s14  ;;  %v1349_v5 = vpack.i.bf16 %v124_v58, %v127_v56 }
 0x1e8   :  { %v134_v59 = vpop.permute.xlu2 %133 }
 0x1e9   :  { %1274 = vmatpush.xpose.msk.msrb.mxu1 %vm135_vm8, %v134_v59 }
 0x1f0   :  { %v132_v60 = vpop.permute.xlu2 %131 }
 0x1f1   :  { %1275 = vmatpush.xpose.msk.msrb.mxu1 %vm135_vm8, %v132_v60  ;;  %v1364_v60 = vpack.i.bf16 %v1523_v22, %v1516_v21 }
 0x1f4   :  { %1276 = vmatmul.msk.f32.vlgmr.msrb.gmra.mxu1 %vm135_vm8, %v124_v58 }
 0x1fc   :  { %1277 = vmatmul.msk.f32.gmra.mxu1 %vm135_vm8, %v127_v56 }
 0x271   :  { %v161_v62 = vpop.f32.mrf.mxu1 }
 0x272   :  { %v162_v63 = vadd.f32 %v161_v62, %v1568_v61 }
 0x274   :  { %v167_v0 = vsel %vm135_vm8, %v162_v63, -inf }
 0x275   :  { %168 = vmax.xlane.f32.xlu0 %v167_v0 }
 0x279   :  { %v164_v2 = vpop.f32.mrf.mxu1 }
 0x27a   :  { %v165_v3 = vadd.f32 %v164_v2, %v1575_v1 }
 0x27c   :  { %v170_v4 = vsel %vm135_vm8, %v165_v3, -inf }
 0x27d   :  { %171 = vmax.xlane.f32.xlu1 %v170_v4 }
 0x289   :  { %1350 = vrot.lane.b32.xlu0 %v1349_v5, %s1454_s19 }
 0x291   :  { %268 = vrot.lane.b32.xlu0 %v124_v58, %s1455_s20 }
 0x296   :  { %270 = vrot.lane.b32.xlu1 %v127_v56, %s1455_s20 }
 0x299   :  { %264 = vrot.lane.b32.xlu0 %v124_v58, %s1456_s21 }
 0x2e8   :  { %v169_v6 = vpop.xlane.xlu0 %168 }
 0x2e9   :  { %v173_v7 = vsub.f32 %v162_v63, %v169_v6 }
 0x2eb   :  { %v175_v8 = vmul.f32 1.442695, %v173_v7 }
 0x2ed   :  { %1396 = vpow2.f32 %v175_v8 }
 0x2f0   :  { %v172_v9 = vpop.xlane.xlu1 %171 }
 0x2f1   :  { %v174_v11 = vsub.f32 %v165_v3, %v172_v9 }
 0x2f3   :  { %v1397_v12 = vpop.eup %1396  ;;  %v177_v13 = vmul.f32 1.442695, %v174_v11  ;;  %v261_v11 = vperm.slane %v1546_v36, 3 }
 0x2f4   :  { %v179_v14 = vsel %vm135_vm8, %v1397_v12, 0.0 }
 0x2f5   :  { %1398 = vpow2.f32 %v177_v13  ;;  %180 = vadd.xlane.f32.xlu2 %v179_v14 }
 0x2fb   :  { %v1399_v15 = vpop.eup %1398  ;;  %v1351_v16 = vpop.permute.xlu0 %1350 }
 0x2fc   :  { %v182_v17 = vsel %vm135_vm8, %v1399_v15, 0.0  ;;  %v1352_v18 = vunpack.i.l.bf16 %v1351_v16  ;;  %v1353_v19 = vunpack.i.h.bf16 %v1351_v16 }
 0x2fd   :  { %183 = vadd.xlane.f32.xlu1 %v182_v17 }
 0x2fe   :  { %215 = vmatpush.msra.mxu2 %v1352_v18 }
 0x300   :  { %216 = vmatpush.msra.mxu2 %v1353_v19 }
 0x303   :  { %v269_v25 = vpop.permute.xlu0 %268 }
 0x308   :  { %v271_v20 = vpop.permute.xlu1 %270 }
 0x309   :  { %1282 = vmatpush.xpose.msk.msrb.mxu2 %vm135_vm8, %v271_v20 }
 0x30b   :  { %v265_v33 = vpop.permute.xlu0 %264 }
 0x30d   :  { %1283 = vmatpush.xpose.msk.msrb.mxu2 %vm135_vm8, %v269_v25 }
 0x316   :  { %266 = vrot.lane.b32.xlu1 %v127_v56, %s1456_s21 }
 0x31e   :  { %1355 = vrot.lane.b32.xlu1 %v1354_v26, %s1457_s1 }
 0x326   :  { %1360 = vrot.lane.b32.xlu1 %v1349_v5, %s1458_s22 }
 0x32e   :  { %1365 = vrot.lane.b32.xlu1 %v1364_v60, %s1457_s1 }
 0x368   :  { %v181_v27 = vpop.xlane.xlu2 %180 }
 0x369   :  { %1400 = vrcp.f32 %v181_v27 }
 0x36f   :  { %v1401_v28 = vpop.eup %1400 }
 0x370   :  { %v184_v29 = vpop.xlane.xlu1 %183  ;;  %v187_v30 = vmul.f32 %v1401_v28, %v1397_v12 }
 0x371   :  { %1402 = vrcp.f32 %v184_v29 }
 0x372   :  { %1278 = vmatmul.msk.f32.vlgmr.msra.gmra.mxu2 %vm135_vm8, %v187_v30 }
 0x377   :  { %v1403_v31 = vpop.eup %1402 }
 0x378   :  { %v188_v32 = vmul.f32 %v1403_v31, %v1399_v15 }
 0x37a   :  { %1279 = vmatmul.msk.f32.gmra.mxu2 %vm135_vm8, %v188_v32 }
 0x382   :  { %1284 = vmatmul.msk.f32.vlgmr.msrb.gmra.mxu2 %vm135_vm8, %v265_v33 }
 0x388   :  { %v267_v23 = vpop.permute.xlu1 %266 }
 0x38a   :  { %1285 = vmatmul.msk.f32.gmra.mxu2 %vm135_vm8, %v267_v23 }
 0x390   :  { %v1356_v24 = vpop.permute.xlu1 %1355 }
 0x391   :  { %v1357_v34 = vunpack.i.l.bf16 %v1356_v24  ;;  %v1358_v35 = vunpack.i.h.bf16 %v1356_v24  ;;  %v96_v24 = vld [vmem:[%s1904_s2 + $0x28] sm:$0xff] }
 0x393   :  { %252 = vmatpush.msra.mxu3 %v1357_v34  ;;  %v94_v34 = vld [vmem:[%s1904_s2 + $0x18] sm:$0xff] }
 0x395   :  { %253 = vmatpush.msra.mxu3 %v1358_v35  ;;  %v92_v35 = vld [vmem:[%s1904_s2 + $0x8] sm:$0xff] }
 0x398   :  { %v1361_v37 = vpop.permute.xlu1 %1360 }
 0x399   :  { %v1362_v38 = vunpack.i.l.bf16 %v1361_v37  ;;  %v1363_v39 = vunpack.i.h.bf16 %v1361_v37 }
 0x39b   :  { %351 = vmatpush.msrb.mxu3 %v1362_v38 }
 0x39d   :  { %352 = vmatpush.msrb.mxu3 %v1363_v39 }
 0x3a0   :  { %v1366_v5 = vpop.permute.xlu1 %1365 }
 0x3a1   :  { %v1367_v6 = vunpack.i.l.bf16 %v1366_v5  ;;  %v1368_v7 = vunpack.i.h.bf16 %v1366_v5  ;;  %v451_v5 = vperm.slane %v1546_v36, 4 }
 0x3a3   :  { %388 = vmatpush.msrb.mxu0 %v1367_v6 }
 0x3a5   :  { %389 = vmatpush.msrb.mxu0 %v1368_v7 }
 0x3f5   :  { %v218_v40 = vpop.f32.mrf.mxu2 }
 0x3f6   :  { %1280 = vmatmul.msk.f32.vlgmr.msra.gmra.mxu3 %vm135_vm8, %v218_v40 }
 0x3fd   :  { %v221_v41 = vpop.f32.mrf.mxu2 }
 0x3fe   :  { %1281 = vmatmul.msk.f32.gmra.mxu3 %vm135_vm8, %v221_v41 }
 0x405   :  { %v297_v42 = vpop.f32.mrf.mxu2 }
 0x406   :  { %v298_v43 = vadd.f32 %v297_v42, %v1568_v61 }
 0x408   :  { %v303_v44 = vsel %vm135_vm8, %v298_v43, -inf }
 0x409   :  { %304 = vmax.xlane.f32.xlu2 %v303_v44 }
 0x40d   :  { %v300_v45 = vpop.f32.mrf.mxu2 }
 0x40e   :  { %v301_v46 = vadd.f32 %v300_v45, %v1575_v1 }
 0x410   :  { %v306_v47 = vsel %vm135_vm8, %v301_v46, -inf }
 0x411   :  { %307 = vmax.xlane.f32.xlu0 %v306_v47 }
 0x479   :  { %v255_v21 = vpop.f32.mrf.mxu3 }
 0x47a   :  { %v262_v12 = vadd.f32 %v261_v11, %v255_v21 }
 0x47c   :  { %v305_v49 = vpop.xlane.xlu2 %304 }
 0x47d   :  { %v309_v50 = vsub.f32 %v298_v43, %v305_v49 }
 0x47f   :  { %v311_v51 = vmul.f32 1.442695, %v309_v50 }
 0x481   :  { %1404 = vpow2.f32 %v311_v51  ;;  %v258_v22 = vpop.f32.mrf.mxu3 }
 0x482   :  { %v263_v17 = vadd.f32 %v261_v11, %v258_v22  ;;  %v576_v11 = vld [vmem:[%s1907_s3 + $0x38] sm:$0xff] }
 0x483   :  { %593 = vmatpush.msra.mxu2 %v576_v11 }
 0x484   :  { %v308_v52 = vpop.xlane.xlu0 %307 }
 0x485   :  { %v310_v54 = vsub.f32 %v301_v46, %v308_v52  ;;  %v445_v52 = vperm.slane %v1546_v36, 6 }
 0x487   :  { %v1405_v55 = vpop.eup %1404  ;;  %v313_v56 = vmul.f32 1.442695, %v310_v54 }
 0x488   :  { %v315_v57 = vsel %vm135_vm8, %v1405_v55, 0.0 }
 0x489   :  { %1406 = vpow2.f32 %v313_v56  ;;  %316 = vadd.xlane.f32.xlu2 %v315_v57  ;;  %v448_v57 = vperm.slane %v1546_v36, 7 }
 0x48f   :  { %v1407_v58 = vpop.eup %1406 }
 0x490   :  { %v318_v59 = vsel %vm135_vm8, %v1407_v58, 0.0 }
 0x491   :  { %319 = vadd.xlane.f32.xlu2 %v318_v59 }
 0x4fc   :  { %v317_v62 = vpop.xlane.xlu2 %316 }
 0x4fd   :  { %1408 = vrcp.f32 %v317_v62 }
 0x503   :  { %v1409_v63 = vpop.eup %1408 }
 0x504   :  { %v320_v0 = vpop.xlane.xlu2 %319  ;;  %v323_v2 = vmul.f32 %v1409_v63, %v1405_v55 }
 0x505   :  { %1410 = vrcp.f32 %v320_v0 }
 0x506   :  { %1286 = vmatmul.msk.f32.vlgmr.msrb.gmra.mxu3 %vm135_vm8, %v323_v2 }
 0x50b   :  { %v1411_v3 = vpop.eup %1410 }
 0x50c   :  { %v324_v4 = vmul.f32 %v1411_v3, %v1407_v58 }
 0x50e   :  { %1287 = vmatmul.msk.f32.gmra.mxu3 %vm135_vm8, %v324_v4 }
 0x589   :  { %v354_v8 = vpop.f32.mrf.mxu3 }
 0x58a   :  { %1288 = vmatmul.msk.f32.vlgmr.msrb.gmra.mxu0 %vm135_vm8, %v354_v8 }
 0x591   :  { %v357_v9 = vpop.f32.mrf.mxu3 }
 0x592   :  { %1289 = vmatmul.msk.f32.gmra.mxu0 %vm135_vm8, %v357_v9 }
 0x607   :  { %v391_v13 = vpop.f32.mrf.mxu0 }
 0x608   :  { %v397_v14 = vadd.f32 %v391_v13, %v262_v12 }
 0x60a   :  { %v399_v15 = vadd.f32 %v397_v14, %v1554_v53 }
 0x60c   :  { %v401_v16 = vsel %vm31_vm0, %v399_v15, 0.0 }
 0x60d   :  { %402 = vadd.xlane.f32.xlu2 %v401_v16 }
 0x60f   :  { %v394_v18 = vpop.f32.mrf.mxu0 }
 0x610   :  { %v398_v19 = vadd.f32 %v394_v18, %v263_v17 }
 0x612   :  { %v400_v20 = vadd.f32 %v398_v19, %v1550_v48  ;;  %v98_v48 = vld [vmem:[%s1904_s2 + $0x38] sm:$0xff]  ;;  %v574_v19 = vld [vmem:[%s1907_s3 + $0x28] sm:$0xff] }
 0x613   :  { %470 = vmatpush.msra.mxu1 %v98_v48 }
 0x614   :  { %v404_v25 = vsel %vm31_vm0, %v400_v20, 0.0 }
 0x615   :  { %405 = vadd.xlane.f32.xlu1 %v404_v25  ;;  %471 = vmatpush.msra.mxu1 %v96_v24 }
 0x617   :  { %472 = vmatpush.msra.mxu1 %v94_v34 }
 0x619   :  { %473 = vmatpush.msra.mxu1 %v92_v35 }
 0x680   :  { %v403_v26 = vpop.xlane.xlu2 %402 }
 0x681   :  { %v407_v27 = vmul.f32 %v403_v26, %v1507_v10 }
 0x683   :  { %v409_v28 = vsub.f32 %v399_v15, %v407_v27  ;;  %v575_v15 = vld [vmem:[%s1907_s3 + $0x30] sm:$0xff]  ;;  %v573_v27 = vld [vmem:[%s1907_s3 + $0x20] sm:$0xff] }
 0x684   :  { %594 = vmatpush.msra.mxu2 %v575_v15 }
 0x685   :  { %v411_v29 = vmul.f32 %v409_v28, %v409_v28 }
 0x686   :  { %595 = vmatpush.msra.mxu2 %v574_v19 }
 0x687   :  { %v413_v30 = vsel %vm31_vm0, %v411_v29, 0.0 }
 0x688   :  { %414 = vadd.xlane.f32.xlu2 %v413_v30  ;;  %v406_v53 = vpop.xlane.xlu1 %405  ;;  %596 = vmatpush.msra.mxu2 %v573_v27 }
 0x689   :  { %v408_v31 = vmul.f32 %v406_v53, %v1507_v10  ;;  %v572_v53 = vld [vmem:[%s1907_s3 + $0x18] sm:$0xff] }
 0x68a   :  { %597 = vmatpush.msra.mxu2 %v572_v53 }
 0x68b   :  { %v410_v32 = vsub.f32 %v400_v20, %v408_v31 }
 0x68d   :  { %v412_v33 = vmul.f32 %v410_v32, %v410_v32 }
 0x68f   :  { %v416_v23 = vsel %vm31_vm0, %v412_v33, 0.0 }
 0x690   :  { %417 = vadd.xlane.f32.xlu2 %v416_v23  ;;  %v571_v23 = vld [vmem:[%s1907_s3 + $0x10] sm:$0xff] }
 0x691   :  { %598 = vmatpush.msra.mxu2 %v571_v23 }
 0x6fb   :  { %v415_v37 = vpop.xlane.xlu2 %414 }
 0x6fc   :  { %v419_v38 = vmul.f32 %v415_v37, %v1507_v10  ;;  %v570_v37 = vld [vmem:[%s1907_s3 + $0x8] sm:$0xff] }
 0x6fd   :  { %599 = vmatpush.msra.mxu2 %v570_v37 }
 0x6fe   :  { %v421_v39 = vadd.f32 1e-12, %v419_v38 }
 0x700   :  { %1412 = vrsqrt.f32 %v421_v39  ;;  %vm429_vm10 = vweird.f32 %v421_v39 }
 0x703   :  { %v418_v40 = vpop.xlane.xlu2 %417 }
 0x704   :  { %v420_v41 = vmul.f32 %v418_v40, %v1507_v10 }
 0x706   :  { %v1413_v42 = vpop.eup %1412  ;;  %v422_v43 = vadd.f32 1e-12, %v420_v41  ;;  %v569_v41 = vld [vmem:[%s1907_s3] sm:$0xff] }
 0x707   :  { %v424_v44 = vmul.f32 %v1413_v42, %v421_v39  ;;  %vm430_vm9 = vweird.f32 %v1413_v42  ;;  %600 = vmatpush.msra.mxu2 %v569_v41 }
 0x708   :  { %1414 = vrsqrt.f32 %v422_v43  ;;  %vm431_vm11 = vmor %vm429_vm10, %vm430_vm9  ;;  %vm439_vm13 = vweird.f32 %v422_v43 }
 0x709   :  { %v425_v45 = vmul.f32 %v1413_v42, %v424_v44 }
 0x70b   :  { %v426_v46 = vmul.f32 0.5, %v425_v45 }
 0x70d   :  { %v427_v47 = vsub.f32 1.5, %v426_v46 }
 0x70e   :  { %v1415_v49 = vpop.eup %1414 }
 0x70f   :  { %v428_v50 = vmul.f32 %v1413_v42, %v427_v47  ;;  %v434_v51 = vmul.f32 %v1415_v49, %v422_v43  ;;  %vm440_vm12 = vweird.f32 %v1415_v49 }
 0x710   :  { %vm441_vm14 = vmor %vm439_vm13, %vm440_vm12 }
 0x711   :  { %v432_v54 = vsel %vm431_vm11, %v1413_v42, %v428_v50  ;;  %v435_v55 = vmul.f32 %v1415_v49, %v434_v51 }
 0x712   :  { %v443_v56 = vmul.f32 %v432_v54, %v409_v28 }
 0x713   :  { %v436_v58 = vmul.f32 0.5, %v435_v55 }
 0x714   :  { %v446_v59 = vmul.f32 %v445_v52, %v443_v56 }
 0x715   :  { %v437_v60 = vsub.f32 1.5, %v436_v58 }
 0x716   :  { %v1636_v62 = vadd.f32 %v448_v57, %v446_v59 }
 0x717   :  { %v438_v63 = vmul.f32 %v1415_v49, %v437_v60 }
 0x718   :  { %1290 = vmatmul.msk.f32.vlgmr.msra.gmra.mxu1 %vm31_vm0, %v1636_v62 }
 0x719   :  { %v442_v0 = vsel %vm441_vm14, %v1415_v49, %v438_v63 }
 0x71a   :  { %v444_v2 = vmul.f32 %v442_v0, %v410_v32 }
 0x71c   :  { %v447_v3 = vmul.f32 %v445_v52, %v444_v2 }
 0x71e   :  { %v1640_v4 = vadd.f32 %v448_v57, %v447_v3 }
 0x720   :  { %1291 = vmatmul.msk.f32.gmra.mxu1 %vm31_vm0, %v1640_v4 }
 0x795   :  { %v475_v6 = vpop.f32.mrf.mxu1 }
 0x796   :  { %v1645_v7 = vadd.f32 %v475_v6, %v451_v5 }
 0x798   :  { %v1648_v21 = vmul.f32 0.70710677, %v1645_v7 }
 0x79a   :  { %v485_v22 = vmul.f32 %v1648_v21, %v1648_v21 }
 0x79c   :  { %v486_v8 = vmin.f32 %v485_v22, 16.0 }
 0x79d   :  { %v478_v9 = vpop.f32.mrf.mxu1 }
 0x79e   :  { %v487_v12 = vmul.f32 2.1237322e-06, %v486_v8  ;;  %v498_v13 = vmul.f32 3.8918573e-05, %v486_v8  ;;  %v1655_v14 = vadd.f32 %v478_v9, %v451_v5 }
 0x7a0   :  { %v488_v16 = vadd.f32 0.00028619796, %v487_v12  ;;  %v499_v17 = vadd.f32 0.001143296, %v498_v13  ;;  %v1661_v18 = vmul.f32 0.70710677, %v1655_v14 }
 0x7a2   :  { %v489_v20 = vmul.f32 %v488_v16, %v486_v8  ;;  %v500_v25 = vmul.f32 %v499_v17, %v486_v8  ;;  %v525_v26 = vmul.f32 %v1661_v18, %v1661_v18 }
 0x7a4   :  { %v501_v28 = vadd.f32 0.014752088, %v500_v25  ;;  %v490_v29 = vadd.f32 0.0036580483, %v489_v20  ;;  %v526_v30 = vmin.f32 %v525_v26, 16.0 }
 0x7a6   :  { %v502_v31 = vmul.f32 %v501_v28, %v486_v8  ;;  %v527_v32 = vmul.f32 2.1237322e-06, %v526_v30  ;;  %v538_v33 = vmul.f32 3.8918573e-05, %v526_v30  ;;  %v491_v24 = vmul.f32 %v490_v29, %v486_v8 }
 0x7a8   :  { %v503_v48 = vadd.f32 0.112945676, %v502_v31  ;;  %v528_v34 = vadd.f32 0.00028619796, %v527_v32  ;;  %v539_v35 = vadd.f32 0.001143296, %v538_v33 }
 0x7a9   :  { %v492_v43 = vadd.f32 0.05243302, %v491_v24  ;;  %v481_v32 = vmul.f32 0.5, %v1645_v7 }
 0x7aa   :  { %v504_v38 = vmul.f32 %v503_v48, %v486_v8  ;;  %v529_v39 = vmul.f32 %v528_v34, %v526_v30  ;;  %v540_v40 = vmul.f32 %v539_v35, %v526_v30 }
 0x7ab   :  { %v493_v50 = vmul.f32 %v492_v43, %v486_v8 }
 0x7ac   :  { %v505_v42 = vadd.f32 0.4994258, %v504_v38  ;;  %v541_v44 = vadd.f32 0.014752088, %v540_v40  ;;  %v530_v46 = vadd.f32 0.0036580483, %v529_v39 }
 0x7ad   :  { %v494_v55 = vadd.f32 0.18741608, %v493_v50  ;;  %v482_v38 = vmul.f32 0.5, %v1655_v14  ;;  %v577_v40 = vperm.slane %v1546_v36, 5 }
 0x7ae   :  { %v506_v45 = vmul.f32 %v505_v42, %v486_v8  ;;  %v542_v47 = vmul.f32 %v541_v44, %v526_v30  ;;  %v531_v52 = vmul.f32 %v530_v46, %v526_v30 }
 0x7af   :  { %v495_v60 = vmul.f32 %v494_v55, %v486_v8 }
 0x7b0   :  { %v507_v49 = vadd.f32 1.0, %v506_v45  ;;  %v543_v51 = vadd.f32 0.112945676, %v542_v47  ;;  %v532_v57 = vadd.f32 0.05243302, %v531_v52 }
 0x7b1   :  { %v496_v6 = vadd.f32 1.1283791, %v495_v60 }
 0x7b2   :  { %1416 = vrcp.f32 %v507_v49  ;;  %v544_v54 = vmul.f32 %v543_v51, %v526_v30  ;;  %v533_v2 = vmul.f32 %v532_v57, %v526_v30  ;;  %v519_v5 = vand.u32 2147483648, %v507_v49  ;;  %v1707_v57 = vld [vmem:[%s1904_s2 + $0x60] sm:$0xff] }
 0x7b3   :  { %v517_v9 = vand.u32 2147483647, %v507_v49  ;;  %vm513_vm1 = vweird.f32 %v507_v49  ;;  %v497_v16 = vmul.f32 %v496_v6, %v1648_v21 }
 0x7b4   :  { %v545_v56 = vadd.f32 0.4994258, %v544_v54  ;;  %v534_v11 = vadd.f32 0.18741608, %v533_v2  ;;  %v520_v13 = vor.u32 1.1754944e-38, %v519_v5 }
 0x7b5   :  { %vm518_vm3 = vcmp.eq.f32.partialorder %v517_v9, 8.507059e+37 }
 0x7b6   :  { %v546_v58 = vmul.f32 %v545_v56, %v526_v30  ;;  %v535_v19 = vmul.f32 %v534_v11, %v526_v30 }
 0x7b8   :  { %v1417_v59 = vpop.eup %1416  ;;  %v547_v0 = vadd.f32 1.0, %v546_v58  ;;  %v536_v29 = vadd.f32 1.1283791, %v535_v19  ;;  %v1713_v58 = vld [vmem:[%s1904_s2 + $0x50] sm:$0xff] }
 0x7b9   :  { %v509_v63 = vmul.f32 %v1417_v59, %v507_v49  ;;  %vm514_vm15 = vweird.f32 %v1417_v59 }
 0x7ba   :  { %1418 = vrcp.f32 %v547_v0  ;;  %vm515_vm2 = vmor %vm513_vm1, %vm514_vm15  ;;  %v559_v28 = vand.u32 2147483648, %v547_v0  ;;  %v557_v31 = vand.u32 2147483647, %v547_v0  ;;  %vm553_vm5 = vweird.f32 %v547_v0 }
 0x7bb   :  { %v510_v3 = vsub.f32 1.0, %v509_v63  ;;  %v537_v30 = vmul.f32 %v536_v29, %v1661_v18 }
 0x7bc   :  { %v560_v48 = vor.u32 1.1754944e-38, %v559_v28  ;;  %vm558_vm9 = vcmp.eq.f32.partialorder %v557_v31, 8.507059e+37 }
 0x7bd   :  { %v511_v22 = vmul.f32 %v1417_v59, %v510_v3 }
 0x7bf   :  { %v512_v12 = vadd.f32 %v1417_v59, %v511_v22 }
 0x7c0   :  { %v1419_v15 = vpop.eup %1418 }
 0x7c1   :  { %v516_v17 = vsel %vm515_vm2, %v1417_v59, %v512_v12  ;;  %v549_v20 = vmul.f32 %v1419_v15, %v547_v0  ;;  %vm554_vm4 = vweird.f32 %v1419_v15  ;;  %v1719_v59 = vld [vmem:[%s1904_s2 + $0x40] sm:$0xff] }
 0x7c2   :  { %v521_v8 = vsel %vm518_vm3, %v520_v13, %v516_v17  ;;  %vm555_vm7 = vmor %vm553_vm5, %vm554_vm4  ;;  %v1379_v63 = vpack.i.bf16 %v1719_v59, %v1713_v58 }
 0x7c3   :  { %v522_v25 = vmul.f32 %v521_v8, %v497_v16  ;;  %v550_v26 = vsub.f32 1.0, %v549_v20 }
 0x7c5   :  { %v1292_v27 = vclamps-f32 %v522_v25, 1.0  ;;  %v551_v53 = vmul.f32 %v1419_v15, %v550_v26 }
 0x7c7   :  { %v565_v33 = vadd.f32 1.0, %v1292_v27  ;;  %v552_v23 = vadd.f32 %v1419_v15, %v551_v53 }
 0x7c9   :  { %v567_v21 = vmul.f32 %v565_v33, %v481_v32  ;;  %v556_v24 = vsel %vm555_vm7, %v1419_v15, %v552_v23  ;;  %v1731_v15 = vld [vmem:[%s1905_s4 + $0x8] sm:$0xff] }
 0x7ca   :  { %v561_v34 = vsel %vm558_vm9, %v560_v48, %v556_v24  ;;  %v654_v19 = vperm.slane %v1731_v15, 0  ;;  %v657_v28 = vperm.slane %v1731_v15, 1  ;;  %v669_v24 = vperm.slane %v1731_v15, 2 }
 0x7cb   :  { %1294 = vmatmul.msk.f32.vlgmr.msra.gmra.mxu2 %vm578_vm6, %v567_v21  ;;  %v562_v35 = vmul.f32 %v561_v34, %v537_v30 }
 0x7cd   :  { %v1293_v37 = vclamps-f32 %v562_v35, 1.0 }
 0x7cf   :  { %v566_v39 = vadd.f32 1.0, %v1293_v37 }
 0x7d1   :  { %v568_v7 = vmul.f32 %v566_v39, %v482_v38 }
 0x7d3   :  { %1295 = vmatmul.msk.f32.gmra.mxu2 %vm578_vm6, %v568_v7 }
 0x84e   :  { %v602_v41 = vpop.f32.mrf.mxu2 }
 0x84f   :  { %v603_v42 = vadd.f32 %v602_v41, %v577_v40 }
 0x851   :  { %v608_v43 = vadd.f32 %v603_v42, %v1636_v62 }
 0x853   :  { %v610_v18 = vsel %vm31_vm0, %v608_v43, 0.0 }
 0x854   :  { %611 = vadd.xlane.f32.xlu0 %v610_v18 }
 0x856   :  { %v605_v44 = vpop.f32.mrf.mxu2 }
 0x857   :  { %v606_v45 = vadd.f32 %v605_v44, %v577_v40 }
 0x859   :  { %v609_v46 = vadd.f32 %v606_v45, %v1640_v4  ;;  %v1701_v4 = vld [vmem:[%s1904_s2 + $0x70] sm:$0xff] }
 0x85a   :  { %688 = vmatpush.msra.mxu3 %v1701_v4  ;;  %v1384_v60 = vpack.i.bf16 %v1707_v57, %v1701_v4 }
 0x85b   :  { %v613_v47 = vsel %vm31_vm0, %v609_v46, 0.0 }
 0x85c   :  { %614 = vadd.xlane.f32.xlu2 %v613_v47  ;;  %689 = vmatpush.msra.mxu3 %v1707_v57 }
 0x85e   :  { %690 = vmatpush.msra.mxu3 %v1713_v58 }
 0x860   :  { %691 = vmatpush.msra.mxu3 %v1719_v59 }
 0x8c7   :  { %v612_v14 = vpop.xlane.xlu0 %611 }
 0x8c8   :  { %v616_v49 = vmul.f32 %v612_v14, %v1507_v10 }
 0x8ca   :  { %v618_v50 = vsub.f32 %v608_v43, %v616_v49 }
 0x8cc   :  { %v620_v51 = vmul.f32 %v618_v50, %v618_v50 }
 0x8ce   :  { %v622_v36 = vsel %vm31_vm0, %v620_v51, 0.0 }
 0x8cf   :  { %623 = vadd.xlane.f32.xlu0 %v622_v36  ;;  %v615_v52 = vpop.xlane.xlu2 %614 }
 0x8d0   :  { %v617_v62 = vmul.f32 %v615_v52, %v1507_v10 }
 0x8d2   :  { %v619_v54 = vsub.f32 %v609_v46, %v617_v62 }
 0x8d4   :  { %v621_v55 = vmul.f32 %v619_v54, %v619_v54 }
 0x8d6   :  { %v625_v56 = vsel %vm31_vm0, %v621_v55, 0.0 }
 0x8d7   :  { %626 = vadd.xlane.f32.xlu2 %v625_v56 }
 0x942   :  { %v624_v0 = vpop.xlane.xlu0 %623 }
 0x943   :  { %v628_v2 = vmul.f32 %v624_v0, %v1507_v10 }
 0x945   :  { %v630_v3 = vadd.f32 1e-12, %v628_v2 }
 0x947   :  { %1420 = vrsqrt.f32 %v630_v3  ;;  %vm638_vm11 = vweird.f32 %v630_v3 }
 0x94a   :  { %v627_v5 = vpop.xlane.xlu2 %626 }
 0x94b   :  { %v629_v6 = vmul.f32 %v627_v5, %v1507_v10 }
 0x94d   :  { %v1421_v22 = vpop.eup %1420  ;;  %v631_v11 = vadd.f32 1e-12, %v629_v6 }
 0x94e   :  { %v633_v9 = vmul.f32 %v1421_v22, %v630_v3  ;;  %vm639_vm10 = vweird.f32 %v1421_v22 }
 0x94f   :  { %1422 = vrsqrt.f32 %v631_v11  ;;  %vm640_vm12 = vmor %vm638_vm11, %vm639_vm10  ;;  %vm648_vm14 = vweird.f32 %v631_v11 }
 0x950   :  { %v634_v12 = vmul.f32 %v1421_v22, %v633_v9 }
 0x952   :  { %v635_v13 = vmul.f32 0.5, %v634_v12 }
 0x954   :  { %v636_v16 = vsub.f32 1.5, %v635_v13 }
 0x955   :  { %v1423_v17 = vpop.eup %1422 }
 0x956   :  { %v637_v8 = vmul.f32 %v1421_v22, %v636_v16  ;;  %v643_v20 = vmul.f32 %v1423_v17, %v631_v11  ;;  %vm649_vm13 = vweird.f32 %v1423_v17 }
 0x957   :  { %vm650_vm15 = vmor %vm648_vm14, %vm649_vm13 }
 0x958   :  { %v641_v25 = vsel %vm640_vm12, %v1421_v22, %v637_v8  ;;  %v644_v27 = vmul.f32 %v1423_v17, %v643_v20 }
 0x959   :  { %v652_v26 = vmul.f32 %v641_v25, %v618_v50 }
 0x95a   :  { %v645_v53 = vmul.f32 0.5, %v644_v27 }
 0x95b   :  { %v655_v29 = vmul.f32 %v654_v19, %v652_v26 }
 0x95c   :  { %v646_v31 = vsub.f32 1.5, %v645_v53 }
 0x95d   :  { %v1735_v32 = vadd.f32 %v657_v28, %v655_v29 }
 0x95e   :  { %v647_v33 = vmul.f32 %v1423_v17, %v646_v31 }
 0x95f   :  { %1304 = vmatmul.msk.f32.vlgmr.msra.gmra.mxu3 %vm31_vm0, %v1735_v32 }
 0x960   :  { %v651_v23 = vsel %vm650_vm15, %v1423_v17, %v647_v33 }
 0x961   :  { %v653_v21 = vmul.f32 %v651_v23, %v619_v54 }
 0x963   :  { %v656_v48 = vmul.f32 %v654_v19, %v653_v21 }
 0x965   :  { %v1739_v30 = vadd.f32 %v657_v28, %v656_v48 }
 0x967   :  { %1305 = vmatmul.msk.f32.gmra.mxu3 %vm31_vm0, %v1739_v30 }
 0x9e2   :  { %v693_v34 = vpop.f32.mrf.mxu3 }
 0x9e3   :  { %v694_v35 = vadd.f32 %v693_v34, %v669_v24 }
 0x9e5   :  { %701 = vrot.lane.b32.xlu1 %v694_v35, %s1453_s14 }
 0x9ea   :  { %v696_v37 = vpop.f32.mrf.mxu3 }
 0x9eb   :  { %v697_v38 = vadd.f32 %v696_v37, %v669_v24 }
 0x9ed   :  { %839 = vrot.lane.b32.xlu2 %v697_v38, %s1455_s20  ;;  %703 = vrot.lane.b32.xlu0 %v697_v38, %s1453_s14  ;;  %v1369_v54 = vpack.i.bf16 %v694_v35, %v697_v38 }
 0x9f5   :  { %833 = vrot.lane.b32.xlu2 %v694_v35, %s1456_s21  ;;  %837 = vrot.lane.b32.xlu0 %v694_v35, %s1455_s20 }
 0x9fd   :  { %835 = vrot.lane.b32.xlu0 %v697_v38, %s1456_s21 }
 0xa47   :  { %v840_v39 = vpop.permute.xlu2 %839 }
 0xa48   :  { %1314 = vmatpush.xpose.msk.msrb.mxu3 %vm135_vm8, %v840_v39 }
 0xa4f   :  { %v834_v42 = vpop.permute.xlu2 %833 }
 0xa57   :  { %v702_v40 = vpop.permute.xlu1 %701 }
 0xa5f   :  { %v704_v7 = vpop.permute.xlu0 %703 }
 0xa60   :  { %1306 = vmatpush.xpose.msk.msra.mxu0 %vm135_vm8, %v704_v7 }
 0xa64   :  { %1307 = vmatpush.xpose.msk.msra.mxu0 %vm135_vm8, %v702_v40 }
 0xa67   :  { %v838_v41 = vpop.permute.xlu0 %837  ;;  %1308 = vmatmul.msk.f32.vlgmr.msra.gmra.mxu0 %vm135_vm8, %v694_v35 }
 0xa68   :  { %1315 = vmatpush.xpose.msk.msrb.mxu3 %vm135_vm8, %v838_v41 }
 0xa6b   :  { %1316 = vmatmul.msk.f32.vlgmr.msrb.gmra.mxu3 %vm135_vm8, %v834_v42 }
 0xa6f   :  { %1309 = vmatmul.msk.f32.gmra.mxu0 %vm135_vm8, %v697_v38  ;;  %v836_v43 = vpop.permute.xlu0 %835 }
 0xa73   :  { %1317 = vmatmul.msk.f32.gmra.mxu3 %vm135_vm8, %v836_v43 }
 0xae4   :  { %v730_v18 = vpop.f32.mrf.mxu0 }
 0xae5   :  { %v731_v44 = vadd.f32 %v730_v18, %v1568_v61 }
 0xae7   :  { %v736_v45 = vsel %vm135_vm8, %v731_v44, -inf }
 0xae8   :  { %737 = vmax.xlane.f32.xlu2 %v736_v45  ;;  %v830_v45 = vperm.slane %v1731_v15, 3 }
 0xaec   :  { %v733_v46 = vpop.f32.mrf.mxu0 }
 0xaed   :  { %v734_v47 = vadd.f32 %v733_v46, %v1575_v1 }
 0xaee   :  { %v866_v14 = vpop.f32.mrf.mxu3 }
 0xaef   :  { %v867_v49 = vadd.f32 %v866_v14, %v1568_v61  ;;  %v739_v50 = vsel %vm135_vm8, %v734_v47, -inf }
 0xaf0   :  { %740 = vmax.xlane.f32.xlu0 %v739_v50 }
 0xaf1   :  { %v872_v51 = vsel %vm135_vm8, %v867_v49, -inf }
 0xaf2   :  { %873 = vmax.xlane.f32.xlu1 %v872_v51 }
 0xaf6   :  { %v869_v36 = vpop.f32.mrf.mxu3 }
 0xaf7   :  { %v870_v52 = vadd.f32 %v869_v36, %v1575_v1 }
 0xaf9   :  { %v875_v62 = vsel %vm135_vm8, %v870_v52, -inf }
 0xafa   :  { %876 = vmax.xlane.f32.xlu2 %v875_v62 }
 0xb0b   :  { %1370 = vrot.lane.b32.xlu1 %v1369_v54, %s1454_s19 }
 0xb13   :  { %1385 = vrot.lane.b32.xlu1 %v1384_v60, %s1457_s1 }
 0xb5b   :  { %v738_v61 = vpop.xlane.xlu2 %737 }
 0xb5c   :  { %v742_v55 = vsub.f32 %v731_v44, %v738_v61 }
 0xb5e   :  { %v744_v56 = vmul.f32 1.442695, %v742_v55 }
 0xb60   :  { %1424 = vpow2.f32 %v744_v56 }
 0xb63   :  { %v741_v0 = vpop.xlane.xlu0 %740 }
 0xb64   :  { %v743_v2 = vsub.f32 %v734_v47, %v741_v0 }
 0xb65   :  { %v874_v3 = vpop.xlane.xlu1 %873 }
 0xb66   :  { %v1425_v5 = vpop.eup %1424  ;;  %v746_v1 = vmul.f32 1.442695, %v743_v2  ;;  %v878_v6 = vsub.f32 %v867_v49, %v874_v3 }
 0xb67   :  { %v748_v22 = vsel %vm135_vm8, %v1425_v5, 0.0 }
 0xb68   :  { %1426 = vpow2.f32 %v746_v1  ;;  %v880_v9 = vmul.f32 1.442695, %v878_v6  ;;  %749 = vadd.xlane.f32.xlu0 %v748_v22 }
 0xb6a   :  { %1428 = vpow2.f32 %v880_v9  ;;  %v1301_v9 = vld [vmem:[%s1904_s2 + $0x68] sm:$0xff] }
 0xb6d   :  { %v877_v11 = vpop.xlane.xlu2 %876 }
 0xb6e   :  { %v1427_v12 = vpop.eup %1426  ;;  %v879_v4 = vsub.f32 %v870_v52, %v877_v11  ;;  %v1299_v11 = vld [vmem:[%s1904_s2 + $0x58] sm:$0xff] }
 0xb6f   :  { %v751_v57 = vsel %vm135_vm8, %v1427_v12, 0.0 }
 0xb70   :  { %v1429_v60 = vpop.eup %1428  ;;  %v882_v13 = vmul.f32 1.442695, %v879_v4  ;;  %752 = vadd.xlane.f32.xlu2 %v751_v57 }
 0xb71   :  { %v884_v16 = vsel %vm135_vm8, %v1429_v60, 0.0 }
 0xb72   :  { %1430 = vpow2.f32 %v882_v13  ;;  %885 = vadd.xlane.f32.xlu0 %v884_v16 }
 0xb78   :  { %v1431_v17 = vpop.eup %1430 }
 0xb79   :  { %v887_v8 = vsel %vm135_vm8, %v1431_v17, 0.0 }
 0xb7a   :  { %888 = vadd.xlane.f32.xlu0 %v887_v8 }
 0xb7d   :  { %v1371_v19 = vpop.permute.xlu1 %1370 }
 0xb7e   :  { %v1372_v20 = vunpack.i.l.bf16 %v1371_v19  ;;  %v1373_v25 = vunpack.i.h.bf16 %v1371_v19 }
 0xb80   :  { %784 = vmatpush.msrb.mxu1 %v1372_v20 }
 0xb82   :  { %785 = vmatpush.msrb.mxu1 %v1373_v25 }
 0xb85   :  { %v1386_v39 = vpop.permute.xlu1 %1385 }
 0xb86   :  { %v1388_v7 = vunpack.i.h.bf16 %v1386_v39  ;;  %v1387_v40 = vunpack.i.l.bf16 %v1386_v39  ;;  %v1020_v39 = vperm.slane %v1731_v15, 4 }
 0xb88   :  { %1375 = vrot.lane.b32.xlu2 %v1369_v54, %s1458_s22  ;;  %957 = vmatpush.msra.mxu1 %v1387_v40 }
 0xb8a   :  { %958 = vmatpush.msra.mxu1 %v1388_v7 }
 0xb8e   :  { %1380 = vrot.lane.b32.xlu0 %v1379_v63, %s1457_s1 }
 0xbdb   :  { %v750_v26 = vpop.xlane.xlu0 %749 }
 0xbdc   :  { %1432 = vrcp.f32 %v750_v26 }
 0xbe2   :  { %v1433_v27 = vpop.eup %1432 }
 0xbe3   :  { %v756_v28 = vmul.f32 %v1433_v27, %v1425_v5  ;;  %v753_v29 = vpop.xlane.xlu2 %752 }
 0xbe4   :  { %1434 = vrcp.f32 %v753_v29 }
 0xbe5   :  { %v886_v53 = vpop.xlane.xlu0 %885  ;;  %1310 = vmatmul.msk.f32.vlgmr.msrb.gmra.mxu1 %vm135_vm8, %v756_v28 }
 0xbe6   :  { %1436 = vrcp.f32 %v886_v53  ;;  %v1014_v53 = vperm.slane %v1731_v15, 6 }
 0xbea   :  { %v1435_v31 = vpop.eup %1434 }
 0xbeb   :  { %v1376_v33 = vpop.permute.xlu2 %1375  ;;  %v757_v23 = vmul.f32 %v1435_v31, %v1427_v12  ;;  %v1297_v12 = vld [vmem:[%s1904_s2 + $0x48] sm:$0xff] }
 0xbec   :  { %v1437_v21 = vpop.eup %1436  ;;  %v1377_v48 = vunpack.i.l.bf16 %v1376_v33  ;;  %v1378_v58 = vunpack.i.h.bf16 %v1376_v33 }
 0xbed   :  { %v889_v24 = vpop.xlane.xlu0 %888  ;;  %1311 = vmatmul.msk.f32.gmra.mxu1 %vm135_vm8, %v757_v23  ;;  %v892_v59 = vmul.f32 %v1437_v21, %v1429_v60  ;;  %v1017_v21 = vperm.slane %v1731_v15, 7 }
 0xbee   :  { %1438 = vrcp.f32 %v889_v24  ;;  %920 = vmatpush.msrb.mxu0 %v1377_v48 }
 0xbf0   :  { %921 = vmatpush.msrb.mxu0 %v1378_v58 }
 0xbf1   :  { %1318 = vmatmul.msk.f32.vlgmr.msrb.gmra.mxu0 %vm135_vm8, %v892_v59 }
 0xbf4   :  { %v1439_v63 = vpop.eup %1438 }
 0xbf5   :  { %v893_v34 = vmul.f32 %v1439_v63, %v1431_v17 }
 0xbf9   :  { %1319 = vmatmul.msk.f32.gmra.mxu0 %vm135_vm8, %v893_v34 }
 0xc00   :  { %v1381_v35 = vpop.permute.xlu0 %1380 }
 0xc01   :  { %v1383_v37 = vunpack.i.h.bf16 %v1381_v35  ;;  %v1382_v38 = vunpack.i.l.bf16 %v1381_v35 }
 0xc03   :  { %821 = vmatpush.msrb.mxu2 %v1382_v38 }
 0xc05   :  { %822 = vmatpush.msrb.mxu2 %v1383_v37 }
 0xc62   :  { %v787_v41 = vpop.f32.mrf.mxu1 }
 0xc63   :  { %1312 = vmatmul.msk.f32.vlgmr.msrb.gmra.mxu2 %vm135_vm8, %v787_v41 }
 0xc6a   :  { %v790_v42 = vpop.f32.mrf.mxu1 }
 0xc6b   :  { %1313 = vmatmul.msk.f32.gmra.mxu2 %vm135_vm8, %v790_v42 }
 0xc6e   :  { %v923_v43 = vpop.f32.mrf.mxu0 }
 0xc6f   :  { %1320 = vmatmul.msk.f32.vlgmr.msra.gmra.mxu1 %vm135_vm8, %v923_v43 }
 0xc76   :  { %v926_v18 = vpop.f32.mrf.mxu0 }
 0xc77   :  { %1321 = vmatmul.msk.f32.gmra.mxu1 %vm135_vm8, %v926_v18 }
 0xce6   :  { %v824_v44 = vpop.f32.mrf.mxu2 }
 0xce7   :  { %v831_v46 = vadd.f32 %v830_v45, %v824_v44  ;;  %v1333_v44 = vld [vmem:[%s1907_s3 + $0x78] sm:$0xff] }
 0xce8   :  { %1162 = vmatpush.msra.mxu3 %v1333_v44 }
 0xcec   :  { %v960_v47 = vpop.f32.mrf.mxu1 }
 0xced   :  { %v966_v14 = vadd.f32 %v960_v47, %v831_v46 }
 0xcee   :  { %v827_v50 = vpop.f32.mrf.mxu2 }
 0xcef   :  { %v968_v49 = vadd.f32 %v966_v14, %v1735_v32  ;;  %v832_v36 = vadd.f32 %v830_v45, %v827_v50  ;;  %v1332_v14 = vld [vmem:[%s1907_s3 + $0x70] sm:$0xff] }
 0xcf0   :  { %1163 = vmatpush.msra.mxu3 %v1332_v14 }
 0xcf1   :  { %v970_v51 = vsel %vm31_vm0, %v968_v49, 0.0 }
 0xcf2   :  { %971 = vadd.xlane.f32.xlu1 %v970_v51 }
 0xcf4   :  { %v963_v52 = vpop.f32.mrf.mxu1 }
 0xcf5   :  { %v967_v62 = vadd.f32 %v963_v52, %v832_v36  ;;  %v1331_v36 = vld [vmem:[%s1907_s3 + $0x68] sm:$0xff] }
 0xcf6   :  { %1164 = vmatpush.msra.mxu3 %v1331_v36 }
 0xcf7   :  { %v969_v54 = vadd.f32 %v967_v62, %v1739_v30  ;;  %v1303_v30 = vld [vmem:[%s1904_s2 + $0x78] sm:$0xff] }
 0xcf8   :  { %1039 = vmatpush.msra.mxu2 %v1303_v30 }
 0xcf9   :  { %v973_v61 = vsel %vm31_vm0, %v969_v54, 0.0 }
 0xcfa   :  { %974 = vadd.xlane.f32.xlu2 %v973_v61  ;;  %1040 = vmatpush.msra.mxu2 %v1301_v9  ;;  %v1330_v61 = vld [vmem:[%s1907_s3 + $0x60] sm:$0xff] }
 0xcfb   :  { %1165 = vmatpush.msra.mxu3 %v1330_v61 }
 0xcfc   :  { %1041 = vmatpush.msra.mxu2 %v1299_v11  ;;  %v1327_v11 = vld [vmem:[%s1907_s3 + $0x48] sm:$0xff] }
 0xcfe   :  { %1042 = vmatpush.msra.mxu2 %v1297_v12 }
 0xd65   :  { %v972_v55 = vpop.xlane.xlu1 %971 }
 0xd66   :  { %v976_v56 = vmul.f32 %v972_v55, %v1507_v10 }
 0xd68   :  { %v978_v0 = vsub.f32 %v968_v49, %v976_v56 }
 0xd6a   :  { %v980_v2 = vmul.f32 %v978_v0, %v978_v0 }
 0xd6c   :  { %v982_v3 = vsel %vm31_vm0, %v980_v2, 0.0  ;;  %v1329_v2 = vld [vmem:[%s1907_s3 + $0x58] sm:$0xff] }
 0xd6d   :  { %983 = vadd.xlane.f32.xlu0 %v982_v3  ;;  %v975_v32 = vpop.xlane.xlu2 %974  ;;  %1166 = vmatpush.msra.mxu3 %v1329_v2 }
 0xd6e   :  { %v977_v5 = vmul.f32 %v975_v32, %v1507_v10 }
 0xd70   :  { %v979_v1 = vsub.f32 %v969_v54, %v977_v5 }
 0xd72   :  { %v981_v6 = vmul.f32 %v979_v1, %v979_v1 }
 0xd74   :  { %v985_v22 = vsel %vm31_vm0, %v981_v6, 0.0 }
 0xd75   :  { %986 = vadd.xlane.f32.xlu1 %v985_v22 }
 0xde0   :  { %v984_v4 = vpop.xlane.xlu0 %983 }
 0xde1   :  { %v988_v57 = vmul.f32 %v984_v4, %v1507_v10 }
 0xde3   :  { %v990_v60 = vadd.f32 1e-12, %v988_v57 }
 0xde5   :  { %1440 = vrsqrt.f32 %v990_v60  ;;  %vm998_vm1 = vweird.f32 %v990_v60 }
 0xde8   :  { %v987_v13 = vpop.xlane.xlu1 %986 }
 0xde9   :  { %v989_v16 = vmul.f32 %v987_v13, %v1507_v10 }
 0xdeb   :  { %v1441_v17 = vpop.eup %1440  ;;  %v991_v8 = vadd.f32 1e-12, %v989_v16 }
 0xdec   :  { %v993_v19 = vmul.f32 %v1441_v17, %v990_v60  ;;  %vm999_vm8 = vweird.f32 %v1441_v17  ;;  %v1326_v60 = vld [vmem:[%s1907_s3 + $0x40] sm:$0xff] }
 0xded   :  { %1442 = vrsqrt.f32 %v991_v8  ;;  %vm1000_vm2 = vmor %vm998_vm1, %vm999_vm8  ;;  %vm1008_vm4 = vweird.f32 %v991_v8 }
 0xdee   :  { %v994_v20 = vmul.f32 %v1441_v17, %v993_v19 }
 0xdf0   :  { %v995_v25 = vmul.f32 0.5, %v994_v20 }
 0xdf2   :  { %v996_v26 = vsub.f32 1.5, %v995_v25 }
 0xdf3   :  { %v1443_v27 = vpop.eup %1442 }
 0xdf4   :  { %v997_v28 = vmul.f32 %v1441_v17, %v996_v26  ;;  %v1003_v29 = vmul.f32 %v1443_v27, %v991_v8  ;;  %vm1009_vm3 = vweird.f32 %v1443_v27 }
 0xdf5   :  { %vm1010_vm5 = vmor %vm1008_vm4, %vm1009_vm3 }
 0xdf6   :  { %v1001_v31 = vsel %vm1000_vm2, %v1441_v17, %v997_v28  ;;  %v1004_v33 = vmul.f32 %v1443_v27, %v1003_v29 }
 0xdf7   :  { %v1012_v23 = vmul.f32 %v1001_v31, %v978_v0 }
 0xdf8   :  { %v1005_v48 = vmul.f32 0.5, %v1004_v33 }
 0xdf9   :  { %v1015_v24 = vmul.f32 %v1014_v53, %v1012_v23 }
 0xdfa   :  { %v1006_v58 = vsub.f32 1.5, %v1005_v48 }
 0xdfb   :  { %v1813_v59 = vadd.f32 %v1017_v21, %v1015_v24 }
 0xdfc   :  { %v1007_v63 = vmul.f32 %v1443_v27, %v1006_v58 }
 0xdfd   :  { %1322 = vmatmul.msk.f32.vlgmr.msra.gmra.mxu2 %vm31_vm0, %v1813_v59 }
 0xdfe   :  { %v1011_v34 = vsel %vm1010_vm5, %v1443_v27, %v1007_v63 }
 0xdff   :  { %v1013_v35 = vmul.f32 %v1011_v34, %v979_v1  ;;  %v1328_v1 = vld [vmem:[%s1907_s3 + $0x50] sm:$0xff] }
 0xe00   :  { %1167 = vmatpush.msra.mxu3 %v1328_v1 }
 0xe01   :  { %v1016_v37 = vmul.f32 %v1014_v53, %v1013_v35 }
 0xe02   :  { %1168 = vmatpush.msra.mxu3 %v1327_v11 }
 0xe03   :  { %v1817_v38 = vadd.f32 %v1017_v21, %v1016_v37 }
 0xe04   :  { %1169 = vmatpush.msra.mxu3 %v1326_v60 }
 0xe05   :  { %1323 = vmatmul.msk.f32.gmra.mxu2 %vm31_vm0, %v1817_v38 }
 0xe80   :  { %v1044_v7 = vpop.f32.mrf.mxu2 }
 0xe81   :  { %v1822_v40 = vadd.f32 %v1044_v7, %v1020_v39 }
 0xe83   :  { %v1825_v41 = vmul.f32 0.70710677, %v1822_v40  ;;  %v1050_v2 = vmul.f32 0.5, %v1822_v40  ;;  %v1147_v40 = vperm.slane %v1731_v15, 5 }
 0xe85   :  { %v1054_v42 = vmul.f32 %v1825_v41, %v1825_v41 }
 0xe87   :  { %v1055_v43 = vmin.f32 %v1054_v42, 16.0 }
 0xe88   :  { %v1047_v18 = vpop.f32.mrf.mxu2 }
 0xe89   :  { %v1056_v45 = vmul.f32 2.1237322e-06, %v1055_v43  ;;  %v1067_v46 = vmul.f32 3.8918573e-05, %v1055_v43  ;;  %v1832_v47 = vadd.f32 %v1047_v18, %v1020_v39 }
 0xe8b   :  { %v1057_v49 = vadd.f32 0.00028619796, %v1056_v45  ;;  %v1068_v50 = vadd.f32 0.001143296, %v1067_v46  ;;  %v1838_v51 = vmul.f32 0.70710677, %v1832_v47 }
 0xe8d   :  { %v1058_v52 = vmul.f32 %v1057_v49, %v1055_v43  ;;  %v1069_v62 = vmul.f32 %v1068_v50, %v1055_v43  ;;  %v1094_v54 = vmul.f32 %v1838_v51, %v1838_v51 }
 0xe8f   :  { %v1070_v55 = vadd.f32 0.014752088, %v1069_v62  ;;  %v1059_v56 = vadd.f32 0.0036580483, %v1058_v52  ;;  %v1095_v0 = vmin.f32 %v1094_v54, 16.0 }
 0xe91   :  { %v1071_v3 = vmul.f32 %v1070_v55, %v1055_v43  ;;  %v1096_v32 = vmul.f32 2.1237322e-06, %v1095_v0  ;;  %v1107_v5 = vmul.f32 3.8918573e-05, %v1095_v0  ;;  %v1060_v22 = vmul.f32 %v1059_v56, %v1055_v43 }
 0xe93   :  { %v1072_v6 = vadd.f32 0.112945676, %v1071_v3  ;;  %v1097_v30 = vadd.f32 0.00028619796, %v1096_v32  ;;  %v1108_v9 = vadd.f32 0.001143296, %v1107_v5 }
 0xe94   :  { %v1061_v16 = vadd.f32 0.05243302, %v1060_v22 }
 0xe95   :  { %v1073_v12 = vmul.f32 %v1072_v6, %v1055_v43  ;;  %v1098_v4 = vmul.f32 %v1097_v30, %v1095_v0  ;;  %v1109_v57 = vmul.f32 %v1108_v9, %v1095_v0  ;;  %v1051_v9 = vmul.f32 0.5, %v1832_v47 }
 0xe96   :  { %v1062_v26 = vmul.f32 %v1061_v16, %v1055_v43 }
 0xe97   :  { %v1074_v13 = vadd.f32 0.4994258, %v1073_v12  ;;  %v1110_v17 = vadd.f32 0.014752088, %v1109_v57  ;;  %v1099_v19 = vadd.f32 0.0036580483, %v1098_v4 }
 0xe98   :  { %v1063_v53 = vadd.f32 0.18741608, %v1062_v26 }
 0xe99   :  { %v1075_v8 = vmul.f32 %v1074_v13, %v1055_v43  ;;  %v1111_v20 = vmul.f32 %v1110_v17, %v1095_v0  ;;  %v1100_v28 = vmul.f32 %v1099_v19, %v1095_v0 }
 0xe9a   :  { %v1064_v48 = vmul.f32 %v1063_v53, %v1055_v43  ;;  %v1231_v53 = vld [vmem:[%s1909_s5 + $0x10] sm:$0xff] }
 0xe9b   :  { %v1076_v25 = vadd.f32 1.0, %v1075_v8  ;;  %v1112_v27 = vadd.f32 0.112945676, %v1111_v20  ;;  %v1101_v33 = vadd.f32 0.05243302, %v1100_v28 }
 0xe9c   :  { %v1065_v37 = vadd.f32 1.1283791, %v1064_v48 }
 0xe9d   :  { %1444 = vrcp.f32 %v1076_v25  ;;  %v1113_v29 = vmul.f32 %v1112_v27, %v1095_v0  ;;  %v1102_v63 = vmul.f32 %v1101_v33, %v1095_v0  ;;  %v1088_v35 = vand.u32 2147483648, %v1076_v25  ;;  %v1229_v33 = vld [vmem:[%s1909_s5] sm:$0xff] }
 0xe9e   :  { %v1086_v7 = vand.u32 2147483647, %v1076_v25  ;;  %vm1082_vm9 = vweird.f32 %v1076_v25  ;;  %v1066_v46 = vmul.f32 %v1065_v37, %v1825_v41 }
 0xe9f   :  { %v1114_v31 = vadd.f32 0.4994258, %v1113_v29  ;;  %v1103_v42 = vadd.f32 0.18741608, %v1102_v63  ;;  %v1089_v44 = vor.u32 1.1754944e-38, %v1088_v35 }
 0xea0   :  { %vm1087_vm11 = vcmp.eq.f32.partialorder %v1086_v7, 8.507059e+37  ;;  %v28_v7 = vld [vmem:[%s1905_s4 + $0x10] sm:$0x3] }
 0xea1   :  { %v1115_v23 = vmul.f32 %v1114_v31, %v1095_v0  ;;  %v1104_v49 = vmul.f32 %v1103_v42, %v1095_v0  ;;  %v1230_v31 = vld [vmem:[%s1909_s5 + $0x8] sm:$0xff] }
 0xea3   :  { %v1445_v21 = vpop.eup %1444  ;;  %v1116_v58 = vadd.f32 1.0, %v1115_v23  ;;  %v1105_v61 = vadd.f32 1.1283791, %v1104_v49  ;;  %v1226_v49 = vperm.slane %v28_v7, 1 }
 0xea4   :  { %v1078_v24 = vmul.f32 %v1445_v21, %v1076_v25  ;;  %vm1083_vm7 = vweird.f32 %v1445_v21 }
 0xea5   :  { %1446 = vrcp.f32 %v1116_v58  ;;  %vm1084_vm10 = vmor %vm1082_vm9, %vm1083_vm7  ;;  %v1128_v54 = vand.u32 2147483648, %v1116_v58  ;;  %v1126_v56 = vand.u32 2147483647, %v1116_v58  ;;  %vm1122_vm13 = vweird.f32 %v1116_v58 }
 0xea6   :  { %v1079_v34 = vsub.f32 1.0, %v1078_v24  ;;  %v1106_v1 = vmul.f32 %v1105_v61, %v1838_v51 }
 0xea7   :  { %v1129_v41 = vor.u32 1.1754944e-38, %v1128_v54  ;;  %vm1127_vm15 = vcmp.eq.f32.partialorder %v1126_v56, 8.507059e+37 }
 0xea8   :  { %v1080_v39 = vmul.f32 %v1445_v21, %v1079_v34 }
 0xeaa   :  { %v1081_v18 = vadd.f32 %v1445_v21, %v1080_v39 }
 0xeab   :  { %v1447_v45 = vpop.eup %1446 }
 0xeac   :  { %v1085_v14 = vsel %vm1084_vm10, %v1445_v21, %v1081_v18  ;;  %v1118_v50 = vmul.f32 %v1447_v45, %v1116_v58  ;;  %vm1123_vm12 = vweird.f32 %v1447_v45 }
 0xead   :  { %v1090_v43 = vsel %vm1087_vm11, %v1089_v44, %v1085_v14  ;;  %vm1124_vm14 = vmor %vm1122_vm13, %vm1123_vm12 }
 0xeae   :  { %v1091_v36 = vmul.f32 %v1090_v43, %v1066_v46  ;;  %v1119_v52 = vsub.f32 1.0, %v1118_v50 }
 0xeb0   :  { %v1324_v62 = vclamps-f32 %v1091_v36, 1.0  ;;  %v1120_v55 = vmul.f32 %v1447_v45, %v1119_v52 }
 0xeb2   :  { %v1134_v3 = vadd.f32 1.0, %v1324_v62  ;;  %v1121_v32 = vadd.f32 %v1447_v45, %v1120_v55 }
 0xeb4   :  { %v1136_v5 = vmul.f32 %v1134_v3, %v1050_v2  ;;  %v1125_v0 = vsel %vm1124_vm14, %v1447_v45, %v1121_v32  ;;  %v1223_v45 = vperm.slane %v28_v7, 0  ;;  %v1389_v3 = vld [vmem:[%s1908_s6] ss:$0 sm:$0xff] }
 0xeb5   :  { %v1130_v6 = vsel %vm1127_vm15, %v1129_v41, %v1125_v0 }
 0xeb6   :  { %1334 = vmatmul.msk.f32.vlgmr.msra.gmra.mxu3 %vm578_vm6, %v1136_v5  ;;  %v1131_v22 = vmul.f32 %v1130_v6, %v1106_v1 }
 0xeb8   :  { %v1325_v30 = vclamps-f32 %v1131_v22, 1.0 }
 0xeba   :  { %v1135_v11 = vadd.f32 1.0, %v1325_v30 }
 0xebc   :  { %v1137_v12 = vmul.f32 %v1135_v11, %v1051_v9 }
 0xebe   :  { %1335 = vmatmul.msk.f32.gmra.mxu3 %vm578_vm6, %v1137_v12 }
 0xf39   :  { %v1171_v4 = vpop.f32.mrf.mxu3 }
 0xf3a   :  { %v1172_v57 = vadd.f32 %v1171_v4, %v1147_v40 }
 0xf3c   :  { %v1177_v60 = vadd.f32 %v1172_v57, %v1813_v59 }
 0xf3e   :  { %v1179_v51 = vsel %vm31_vm0, %v1177_v60, 0.0 }
 0xf3f   :  { %1180 = vadd.xlane.f32.xlu2 %v1179_v51 }
 0xf41   :  { %v1174_v13 = vpop.f32.mrf.mxu3 }
 0xf42   :  { %v1175_v16 = vadd.f32 %v1174_v13, %v1147_v40 }
 0xf44   :  { %v1178_v17 = vadd.f32 %v1175_v16, %v1817_v38  ;;  %v1232_v38 = vld [vmem:[%s1909_s5 + $0x18] sm:$0xff] }
 0xf45   :  { %1255 = vmatpush.msra.mxu0 %v1232_v38 }
 0xf46   :  { %v1182_v8 = vsel %vm31_vm0, %v1178_v17, 0.0 }
 0xf47   :  { %1183 = vadd.xlane.f32.xlu1 %v1182_v8  ;;  %1256 = vmatpush.msra.mxu0 %v1231_v53 }
 0xf49   :  { %1257 = vmatpush.msra.mxu0 %v1230_v31 }
 0xf4b   :  { %1258 = vmatpush.msra.mxu0 %v1229_v33 }
 0xfb2   :  { %v1181_v47 = vpop.xlane.xlu2 %1180 }
 0xfb3   :  { %v1185_v19 = vmul.f32 %v1181_v47, %v1507_v10 }
 0xfb5   :  { %v1187_v20 = vsub.f32 %v1177_v60, %v1185_v19 }
 0xfb7   :  { %v1189_v25 = vmul.f32 %v1187_v20, %v1187_v20 }
 0xfb9   :  { %v1191_v15 = vsel %vm31_vm0, %v1189_v25, 0.0 }
 0xfba   :  { %1192 = vadd.xlane.f32.xlu0 %v1191_v15  ;;  %v1184_v26 = vpop.xlane.xlu1 %1183 }
 0xfbb   :  { %v1186_v59 = vmul.f32 %v1184_v26, %v1507_v10 }
 0xfbd   :  { %v1188_v27 = vsub.f32 %v1178_v17, %v1186_v59 }
 0xfbf   :  { %v1190_v28 = vmul.f32 %v1188_v27, %v1188_v27 }
 0xfc1   :  { %v1194_v29 = vsel %vm31_vm0, %v1190_v28, 0.0 }
 0xfc2   :  { %1195 = vadd.xlane.f32.xlu2 %v1194_v29 }
0x102d   :  { %v1193_v23 = vpop.xlane.xlu0 %1192 }
0x102e   :  { %v1197_v21 = vmul.f32 %v1193_v23, %v1507_v10 }
0x1030   :  { %v1199_v48 = vadd.f32 1e-12, %v1197_v21 }
0x1032   :  { %1448 = vrsqrt.f32 %v1199_v48  ;;  %vm1207_vm8 = vweird.f32 %v1199_v48 }
0x1035   :  { %v1196_v24 = vpop.xlane.xlu2 %1195 }
0x1036   :  { %v1198_v58 = vmul.f32 %v1196_v24, %v1507_v10 }
0x1038   :  { %v1449_v63 = vpop.eup %1448  ;;  %v1200_v35 = vadd.f32 1e-12, %v1198_v58 }
0x1039   :  { %v1202_v34 = vmul.f32 %v1449_v63, %v1199_v48  ;;  %vm1208_vm6 = vweird.f32 %v1449_v63 }
0x103a   :  { %1450 = vrsqrt.f32 %v1200_v35  ;;  %vm1209_vm1 = vmor %vm1207_vm8, %vm1208_vm6  ;;  %vm1217_vm3 = vweird.f32 %v1200_v35 }
0x103b   :  { %v1203_v37 = vmul.f32 %v1449_v63, %v1202_v34 }
0x103d   :  { %v1204_v39 = vmul.f32 0.5, %v1203_v37 }
0x103f   :  { %v1205_v42 = vsub.f32 1.5, %v1204_v39 }
0x1040   :  { %v1451_v18 = vpop.eup %1450 }
0x1041   :  { %v1206_v44 = vmul.f32 %v1449_v63, %v1205_v42  ;;  %v1212_v46 = vmul.f32 %v1451_v18, %v1200_v35  ;;  %vm1218_vm2 = vweird.f32 %v1451_v18 }
0x1042   :  { %vm1219_vm4 = vmor %vm1217_vm3, %vm1218_vm2 }
0x1043   :  { %v1210_v14 = vsel %vm1209_vm1, %v1449_v63, %v1206_v44  ;;  %v1213_v43 = vmul.f32 %v1451_v18, %v1212_v46 }
0x1044   :  { %v1221_v10 = vmul.f32 %v1210_v14, %v1187_v20 }
0x1045   :  { %v1214_v36 = vmul.f32 0.5, %v1213_v43 }
0x1046   :  { %v1224_v50 = vmul.f32 %v1223_v45, %v1221_v10 }
0x1047   :  { %v1215_v52 = vsub.f32 1.5, %v1214_v36 }
0x1048   :  { %v1227_v62 = vadd.f32 %v1226_v49, %v1224_v50 }
0x1049   :  { %v1216_v54 = vmul.f32 %v1451_v18, %v1215_v52 }
0x104a   :  { %1336 = vmatmul.msk.f32.vlgmr.msra.gmra.mxu0 %vm31_vm0, %v1227_v62 }
0x104b   :  { %v1220_v61 = vsel %vm1219_vm4, %v1451_v18, %v1216_v54 }
0x104c   :  { %v1222_v55 = vmul.f32 %v1220_v61, %v1188_v27 }
0x104e   :  { %v1225_v56 = vmul.f32 %v1223_v45, %v1222_v55 }
0x1050   :  { %v1228_v2 = vadd.f32 %v1226_v49, %v1225_v56 }
0x1052   :  { %1337 = vmatmul.msk.f32.gmra.mxu0 %vm31_vm0, %v1228_v2 }
0x10c7   :  { %v1260_v32 = vpop.f32.mrf.mxu0 }
0x10c8   :  { %v1261_v5 = vadd.f32 %v1389_v3, %v1260_v32 }
0x10ca   :  { %1266 = vst [vmem:[%s1910_s7] sm:$0xff] %v1261_v5 }
0x10cf   :  { %v1263_v41 = vpop.f32.mrf.mxu0 }
0x10d0   :  { %v1264_v1 = vadd.f32 %v1389_v3, %v1263_v41 }
0x10d2   :  { %1267 = vst [vmem:[%s1910_s7 + $0x8] sm:$0xff] %v1264_v1 }

</bundles_post_ra>
